<compile_context>
chip_gen: v6e
topology: v6e:2x2x1
jax: 0.10.0
libtpu: 0.0.40
codegen_flags: <defaults>
</compile_context>

<pallas_src>
import jax
import jax.numpy as jnp
from jax.experimental import pallas as pl
from jax.experimental.pallas import tpu as pltpu

# ----------------------------- config ---------------------------------------
B = 2          # batch
S = 8          # sequence length
N = B * S      # flattened token count
H = 32         # hidden size
NH = 4         # attention heads
HD = H // NH   # head dim
FF = 64        # intermediate (feed-forward) size
L = 2          # number of encoder layers
VOCAB = 50
N_CLASSES = 3
CPAD = 128     # lane-padded classifier width
LN_EPS = 1e-12
NEG_INF = -1e9


# ----------------------------- kernel helpers --------------------------------
def _layernorm(x, g, b):
    mu = jnp.mean(x, axis=-1, keepdims=True)
    var = jnp.mean((x - mu) ** 2, axis=-1, keepdims=True)
    return (x - mu) * jax.lax.rsqrt(var + LN_EPS) * g + b


# ----------------------------- fused kernel ----------------------------------
def fused_bert_kernel(x_ref, amask_ref, embg_ref, embb_ref,
                      wqkv_ref, bqkv_ref, wo_ref, bo_ref, ln1g_ref, ln1b_ref,
                      w1_ref, b1_ref, w2_ref, b2_ref, ln2g_ref, ln2b_ref,
                      wp_ref, bp_ref, wc_ref, bc_ref, o_ref):
    # Additive mask (NH, N, N): block-diagonal over batch + key padding.
    # Hoisted/broadcast ONCE (JAX does not CSE broadcast_in_dim inside the
    # unrolled layer loop).
    amask = jnp.broadcast_to(amask_ref[...][None, :, :], (NH, N, N))

    # Embedding LayerNorm on the flat (N, H) activation.
    x = _layernorm(x_ref[...], embg_ref[...], embb_ref[...])        # (N, H) f32

    for l in range(L):                                              # static unroll, L=2
        # ---- fused QKV projection: one MXU push for all tokens/heads ----
        qkv = jnp.dot(x.astype(jnp.bfloat16), wqkv_ref[l],
                      preferred_element_type=jnp.float32) + bqkv_ref[l]   # (N, 3H) f32
        qkv = qkv.astype(jnp.bfloat16)                              # cast once

        # ---- attention scores, all heads, ONE softmax ----
        # Lane slices at multiples of HD stay inside a single 128-lane tile
        # (cheap XLU shifts on an otherwise idle slot).
        scores = []
        for h in range(NH):                                         # static unroll, NH=4
            qh = qkv[:, h * HD:(h + 1) * HD]                        # (N, HD)  (scale folded into Wq)
            kh = qkv[:, H + h * HD:H + (h + 1) * HD]                # (N, HD)
            scores.append(jnp.einsum("nd,md->nm", qh, kh,
                                     preferred_element_type=jnp.float32))  # (N, N)
        s = jnp.stack(scores, axis=0) + amask                       # (NH, N, N)
        s = s - jnp.max(s, axis=-1, keepdims=True)
        p = jnp.exp(s)
        p = p * pl.reciprocal(jnp.sum(p, axis=-1, keepdims=True), approx=True)
        p = p.astype(jnp.bfloat16)

        # ---- per-head context, lane-concat, ONE Wo matmul ----
        ctx = []
        for h in range(NH):
            vh = qkv[:, 2 * H + h * HD:2 * H + (h + 1) * HD]        # (N, HD)
            ctx.append(jnp.dot(p[h], vh, preferred_element_type=jnp.float32))
        ctx = jnp.concatenate(ctx, axis=1)                          # (N, H) f32

        attn = jnp.dot(ctx.astype(jnp.bfloat16), wo_ref[l],
                       preferred_element_type=jnp.float32) + bo_ref[l]
        x1 = _layernorm(x + attn, ln1g_ref[l], ln1b_ref[l])         # (N, H)

        # ---- feed-forward ----
        hid = jnp.dot(x1.astype(jnp.bfloat16), w1_ref[l],
                      preferred_element_type=jnp.float32) + b1_ref[l]     # (N, FF)
        # TODO(synk): HF BERT default is exact (erf) GELU; tanh approximation
        # kept for guaranteed Mosaic lowering (small numeric drift vs PyTorch).
        hid = jax.nn.gelu(hid, approximate=True)
        ffn = jnp.dot(hid.astype(jnp.bfloat16), w2_ref[l],
                      preferred_element_type=jnp.float32) + b2_ref[l]     # (N, H)
        x = _layernorm(x1 + ffn, ln2g_ref[l], ln2b_ref[l])

    # ---- pooler (tanh on [CLS]) + dropout(p=0.3, eval => identity) + classifier ----
    cls = jnp.concatenate([x[b * S:b * S + 1, :] for b in range(B)], axis=0)   # (B, H)
    pooled = jnp.tanh(jnp.dot(cls.astype(jnp.bfloat16), wp_ref[...],
                              preferred_element_type=jnp.float32) + bp_ref[...])
    o_ref[...] = (jnp.dot(pooled.astype(jnp.bfloat16), wc_ref[...],
                          preferred_element_type=jnp.float32) + bc_ref[...])   # (B, CPAD)


# ----------------------------- pallas_call wrapper ----------------------------
def fused_bert_call(x, amask, p):
    args = (x, amask, p["emb_ln_g"], p["emb_ln_b"],
            p["wqkv"], p["bqkv"], p["wo"], p["bo"], p["ln1_g"], p["ln1_b"],
            p["w1"], p["b1"], p["w2"], p["b2"], p["ln2_g"], p["ln2_b"],
            p["pooler_w"], p["pooler_b"], p["cls_w"], p["cls_b"])
    vmem = pl.BlockSpec(memory_space=pltpu.MemorySpace.VMEM)
    # No grid: single invocation, all operands (~50 KB) resident in VMEM.
    # TODO(synk): at real-BERT scale (H=768, L=12) switch to grid=(L,) with
    # per-layer index_maps so layer weights stream (v7x physical VMEM is only
    # 64 MiB), set vmem_limit_bytes, and add a 'parallel' batch/q-tile axis so
    # the second v7x TensorCore is used; at B=2/S=8 that is pure overhead.
    return pl.pallas_call(
        fused_bert_kernel,
        out_shape=jax.ShapeDtypeStruct((B, CPAD), jnp.float32),
        in_specs=[vmem] * len(args),
        out_specs=vmem,
        cost_estimate=pl.CostEstimate(flops=620_000, transcendentals=4_500,
                                      bytes_accessed=70_000),
    )(*args)


# ----------------------------- parameters ------------------------------------
def init_params(key):
    scale = 0.02
    keys = iter(jax.random.split(key, 32))

    def normal(shape):
        return (scale * jax.random.normal(next(keys), shape)).astype(jnp.float32)

    inv_sqrt_hd = 1.0 / float(HD) ** 0.5

    wqkv_l, bqkv_l, wo_l, bo_l, ln1g_l, ln1b_l = [], [], [], [], [], []
    w1_l, b1_l, w2_l, b2_l, ln2g_l, ln2b_l = [], [], [], [], [], []
    for _ in range(L):
        # 1/sqrt(head_dim) attention scale folded into the Q projection.
        # Invariant: the Q BIAS must be scaled too (trivial here, bias is zero,
        # but required when porting real pretrained weights).
        wq = normal((H, H)) * inv_sqrt_hd
        bq = jnp.zeros((H,), jnp.float32) * inv_sqrt_hd
        wk, bk = normal((H, H)), jnp.zeros((H,), jnp.float32)
        wv, bv = normal((H, H)), jnp.zeros((H,), jnp.float32)
        wqkv_l.append(jnp.concatenate([wq, wk, wv], axis=1))       # (H, 3H)
        bqkv_l.append(jnp.concatenate([bq, bk, bv])[None, :])      # (1, 3H)
        wo_l.append(normal((H, H)))
        bo_l.append(jnp.zeros((1, H), jnp.float32))
        ln1g_l.append(jnp.ones((1, H), jnp.float32))
        ln1b_l.append(jnp.zeros((1, H), jnp.float32))
        w1_l.append(normal((H, FF)))
        b1_l.append(jnp.zeros((1, FF), jnp.float32))
        w2_l.append(normal((FF, H)))
        b2_l.append(jnp.zeros((1, H), jnp.float32))
        ln2g_l.append(jnp.ones((1, H), jnp.float32))
        ln2b_l.append(jnp.zeros((1, H), jnp.float32))

    cls_w = normal((H, N_CLASSES))
    cls_w_pad = jnp.zeros((H, CPAD), jnp.float32).at[:, :N_CLASSES].set(cls_w)

    return {
        "word_emb": normal((VOCAB, H)),
        "pos_emb": normal((S, H)),
        "tok_emb": normal((2, H)),
        "emb_ln_g": jnp.ones((1, H), jnp.float32),
        "emb_ln_b": jnp.zeros((1, H), jnp.float32),
        # Stacked per-layer weights; matmul weights stored in bf16 for the MXU.
        "wqkv": jnp.stack(wqkv_l).astype(jnp.bfloat16),   # (L, H, 3H)
        "bqkv": jnp.stack(bqkv_l),                        # (L, 1, 3H) f32
        "wo": jnp.stack(wo_l).astype(jnp.bfloat16),       # (L, H, H)
        "bo": jnp.stack(bo_l),
        "ln1_g": jnp.stack(ln1g_l), "ln1_b": jnp.stack(ln1b_l),
        "w1": jnp.stack(w1_l).astype(jnp.bfloat16),       # (L, H, FF)
        "b1": jnp.stack(b1_l),
        "w2": jnp.stack(w2_l).astype(jnp.bfloat16),       # (L, FF, H)
        "b2": jnp.stack(b2_l),
        "ln2_g": jnp.stack(ln2g_l), "ln2_b": jnp.stack(ln2b_l),
        "pooler_w": normal((H, H)).astype(jnp.bfloat16),
        "pooler_b": jnp.zeros((1, H), jnp.float32),
        "cls_w": cls_w_pad.astype(jnp.bfloat16),          # (H, 128) lane-padded
        "cls_b": jnp.zeros((1, CPAD), jnp.float32),
    }


# ----------------------------- forward ---------------------------------------
def sentiment_classifier_forward(params, input_ids, attention_mask):
    # Embedding gathers (glue, plain JAX); token_type_ids assumed all-zero.
    word = params["word_emb"][input_ids]                       # (B, S, H)
    pos = params["pos_emb"][None, :, :]                        # (1, S, H)
    tok = params["tok_emb"][0][None, None, :]                  # (1, 1, H)
    x = (word + pos + tok).astype(jnp.float32).reshape(N, H)   # flat (B*S, H)

    # Combined additive mask (N, N): 0 where query/key are in the SAME example
    # AND the key is not padding, -1e9 otherwise (block-diagonal over batch).
    batch_id = jnp.repeat(jnp.arange(B), S)                    # (N,)
    key_ok = attention_mask.reshape(-1) > 0                    # (N,)
    valid = (batch_id[:, None] == batch_id[None, :]) & key_ok[None, :]
    amask = jnp.where(valid, 0.0, NEG_INF).astype(jnp.float32)  # (N, N)

    logits_pad = fused_bert_call(x, amask, params)             # (B, CPAD)
    return logits_pad[:, :N_CLASSES]                           # (B, N_CLASSES)


# ----------------------------- main -------------------------------------------
if __name__ == "__main__":
    key = jax.random.PRNGKey(0)
    pkey, ikey = jax.random.split(key)

    params = init_params(pkey)
    input_ids = jax.random.randint(ikey, (B, S), 0, VOCAB, dtype=jnp.int32)
    attention_mask = jnp.array(
        [[1, 1, 1, 1, 1, 1, 1, 1],
         [1, 1, 1, 1, 1, 0, 0, 0]], dtype=jnp.int32)           # second example padded

    logits = sentiment_classifier_forward(params, input_ids, attention_mask)
    logits = jax.block_until_ready(logits)
    assert logits.shape == (B, N_CLASSES)
    assert bool(jnp.all(jnp.isfinite(logits)))
    print("KERNEL_OK")
</pallas_src>

<mosaic_0001>
module attributes {stable_mosaic.version = 11 : i64} {
  func.func @fused_bert_kernel(%arg0: memref<16x32xf32, #tpu.memory_space<vmem>>, %arg1: memref<16x16xf32, #tpu.memory_space<vmem>>, %arg2: memref<1x32xf32, #tpu.memory_space<vmem>>, %arg3: memref<1x32xf32, #tpu.memory_space<vmem>>, %arg4: memref<2x32x96xbf16, #tpu.memory_space<vmem>>, %arg5: memref<2x1x96xf32, #tpu.memory_space<vmem>>, %arg6: memref<2x32x32xbf16, #tpu.memory_space<vmem>>, %arg7: memref<2x1x32xf32, #tpu.memory_space<vmem>>, %arg8: memref<2x1x32xf32, #tpu.memory_space<vmem>>, %arg9: memref<2x1x32xf32, #tpu.memory_space<vmem>>, %arg10: memref<2x32x64xbf16, #tpu.memory_space<vmem>>, %arg11: memref<2x1x64xf32, #tpu.memory_space<vmem>>, %arg12: memref<2x64x32xbf16, #tpu.memory_space<vmem>>, %arg13: memref<2x1x32xf32, #tpu.memory_space<vmem>>, %arg14: memref<2x1x32xf32, #tpu.memory_space<vmem>>, %arg15: memref<2x1x32xf32, #tpu.memory_space<vmem>>, %arg16: memref<32x32xbf16, #tpu.memory_space<vmem>>, %arg17: memref<1x32xf32, #tpu.memory_space<vmem>>, %arg18: memref<32x128xbf16, #tpu.memory_space<vmem>>, %arg19: memref<1x128xf32, #tpu.memory_space<vmem>>, %arg20: memref<2x128xf32, #tpu.memory_space<vmem>>) attributes {dimension_semantics = [], scalar_prefetch = 0 : i64, scratch_operands = 0 : i64, tpu.core_type = #tpu.core_type<tc>} {
    %c0 = arith.constant 0 : index
    %c0_0 = arith.constant 0 : index
    %0 = vector.load %arg1[%c0, %c0_0] : memref<16x16xf32, #tpu.memory_space<vmem>>, vector<16x16xf32>
    %1 = vector.shape_cast %0 : vector<16x16xf32> to vector<1x16x16xf32>
    %2 = vector.shape_cast %1 : vector<1x16x16xf32> to vector<1x16x16xf32>
    %3 = vector.broadcast %2 : vector<1x16x16xf32> to vector<4x16x16xf32>
    %c0_1 = arith.constant 0 : index
    %c0_2 = arith.constant 0 : index
    %4 = vector.load %arg0[%c0_1, %c0_2] : memref<16x32xf32, #tpu.memory_space<vmem>>, vector<16x32xf32>
    %c0_3 = arith.constant 0 : index
    %c0_4 = arith.constant 0 : index
    %5 = vector.load %arg2[%c0_3, %c0_4] : memref<1x32xf32, #tpu.memory_space<vmem>>, vector<1x32xf32>
    %c0_5 = arith.constant 0 : index
    %c0_6 = arith.constant 0 : index
    %6 = vector.load %arg3[%c0_5, %c0_6] : memref<1x32xf32, #tpu.memory_space<vmem>>, vector<1x32xf32>
    %cst = arith.constant dense<0.000000e+00> : vector<16xf32>
    %7 = vector.multi_reduction <add>, %4, %cst [1] : vector<16x32xf32> to vector<16xf32>
    %8 = vector.shape_cast %7 : vector<16xf32> to vector<16x1xf32>
    %cst_7 = arith.constant 3.200000e+01 : f32
    %9 = vector.broadcast %cst_7 : f32 to vector<16x1xf32>
    %10 = arith.divf %8, %9 : vector<16x1xf32>
    %11 = vector.broadcast %10 : vector<16x1xf32> to vector<16x32xf32>
    %12 = arith.subf %4, %11 : vector<16x32xf32>
    %13 = arith.mulf %12, %12 : vector<16x32xf32>
    %cst_8 = arith.constant dense<0.000000e+00> : vector<16xf32>
    %14 = vector.multi_reduction <add>, %13, %cst_8 [1] : vector<16x32xf32> to vector<16xf32>
    %15 = vector.shape_cast %14 : vector<16xf32> to vector<16x1xf32>
    %cst_9 = arith.constant 3.200000e+01 : f32
    %16 = vector.broadcast %cst_9 : f32 to vector<16x1xf32>
    %17 = arith.divf %15, %16 : vector<16x1xf32>
    %18 = vector.broadcast %10 : vector<16x1xf32> to vector<16x32xf32>
    %19 = arith.subf %4, %18 : vector<16x32xf32>
    %cst_10 = arith.constant 9.99999996E-13 : f32
    %20 = vector.broadcast %cst_10 : f32 to vector<16x1xf32>
    %21 = arith.addf %17, %20 : vector<16x1xf32>
    %22 = math.rsqrt %21 : vector<16x1xf32>
    %23 = vector.broadcast %22 : vector<16x1xf32> to vector<16x32xf32>
    %24 = arith.mulf %19, %23 : vector<16x32xf32>
    %25 = vector.broadcast %5 : vector<1x32xf32> to vector<16x32xf32>
    %26 = arith.mulf %24, %25 : vector<16x32xf32>
    %27 = vector.broadcast %6 : vector<1x32xf32> to vector<16x32xf32>
    %28 = arith.addf %26, %27 : vector<16x32xf32>
    %29 = arith.truncf %28 : vector<16x32xf32> to vector<16x32xbf16>
    %c0_11 = arith.constant 0 : index
    %c0_12 = arith.constant 0 : index
    %c0_13 = arith.constant 0 : index
    %30 = vector.load %arg4[%c0_11, %c0_12, %c0_13] : memref<2x32x96xbf16, #tpu.memory_space<vmem>>, vector<1x32x96xbf16>
    %31 = vector.shape_cast %30 : vector<1x32x96xbf16> to vector<32x96xbf16>
    %cst_14 = arith.constant dense<0.000000e+00> : vector<16x96xf32>
    %32 = tpu.matmul %29, %31, %cst_14 {dimension_numbers = #tpu.dot_dimension_numbers<[1], [0], [0], [1], [0, 0, 1, 1], [], []>} : vector<16x32xbf16>, vector<32x96xbf16>, vector<16x96xf32> -> vector<16x96xf32>
    %c0_15 = arith.constant 0 : index
    %c0_16 = arith.constant 0 : index
    %c0_17 = arith.constant 0 : index
    %33 = vector.load %arg5[%c0_15, %c0_16, %c0_17] : memref<2x1x96xf32, #tpu.memory_space<vmem>>, vector<1x1x96xf32>
    %34 = vector.shape_cast %33 : vector<1x1x96xf32> to vector<1x96xf32>
    %35 = vector.broadcast %34 : vector<1x96xf32> to vector<16x96xf32>
    %36 = arith.addf %32, %35 : vector<16x96xf32>
    %37 = arith.truncf %36 : vector<16x96xf32> to vector<16x96xbf16>
    %38 = vector.extract_strided_slice %37 {offsets = [0, 0], sizes = [16, 8], strides = [1, 1]} : vector<16x96xbf16> to vector<16x8xbf16>
    %39 = vector.extract_strided_slice %37 {offsets = [0, 32], sizes = [16, 8], strides = [1, 1]} : vector<16x96xbf16> to vector<16x8xbf16>
    "tpu.trace_start"() <{level = 10 : i32, message = "nd,md->nm"}> : () -> ()
    %cst_18 = arith.constant dense<0.000000e+00> : vector<16x16xf32>
    %40 = tpu.matmul %38, %39, %cst_18 {dimension_numbers = #tpu.dot_dimension_numbers<[1], [1], [0], [0], [0, 0, 1, 0], [], []>} : vector<16x8xbf16>, vector<16x8xbf16>, vector<16x16xf32> -> vector<16x16xf32>
    "tpu.trace_stop"() : () -> ()
    %41 = vector.extract_strided_slice %37 {offsets = [0, 8], sizes = [16, 8], strides = [1, 1]} : vector<16x96xbf16> to vector<16x8xbf16>
    %42 = vector.extract_strided_slice %37 {offsets = [0, 40], sizes = [16, 8], strides = [1, 1]} : vector<16x96xbf16> to vector<16x8xbf16>
    "tpu.trace_start"() <{level = 10 : i32, message = "nd,md->nm"}> : () -> ()
    %cst_19 = arith.constant dense<0.000000e+00> : vector<16x16xf32>
    %43 = tpu.matmul %41, %42, %cst_19 {dimension_numbers = #tpu.dot_dimension_numbers<[1], [1], [0], [0], [0, 0, 1, 0], [], []>} : vector<16x8xbf16>, vector<16x8xbf16>, vector<16x16xf32> -> vector<16x16xf32>
    "tpu.trace_stop"() : () -> ()
    %44 = vector.extract_strided_slice %37 {offsets = [0, 16], sizes = [16, 8], strides = [1, 1]} : vector<16x96xbf16> to vector<16x8xbf16>
    %45 = vector.extract_strided_slice %37 {offsets = [0, 48], sizes = [16, 8], strides = [1, 1]} : vector<16x96xbf16> to vector<16x8xbf16>
    "tpu.trace_start"() <{level = 10 : i32, message = "nd,md->nm"}> : () -> ()
    %cst_20 = arith.constant dense<0.000000e+00> : vector<16x16xf32>
    %46 = tpu.matmul %44, %45, %cst_20 {dimension_numbers = #tpu.dot_dimension_numbers<[1], [1], [0], [0], [0, 0, 1, 0], [], []>} : vector<16x8xbf16>, vector<16x8xbf16>, vector<16x16xf32> -> vector<16x16xf32>
    "tpu.trace_stop"() : () -> ()
    %47 = vector.extract_strided_slice %37 {offsets = [0, 24], sizes = [16, 8], strides = [1, 1]} : vector<16x96xbf16> to vector<16x8xbf16>
    %48 = vector.extract_strided_slice %37 {offsets = [0, 56], sizes = [16, 8], strides = [1, 1]} : vector<16x96xbf16> to vector<16x8xbf16>
    "tpu.trace_start"() <{level = 10 : i32, message = "nd,md->nm"}> : () -> ()
    %cst_21 = arith.constant dense<0.000000e+00> : vector<16x16xf32>
    %49 = tpu.matmul %47, %48, %cst_21 {dimension_numbers = #tpu.dot_dimension_numbers<[1], [1], [0], [0], [0, 0, 1, 0], [], []>} : vector<16x8xbf16>, vector<16x8xbf16>, vector<16x16xf32> -> vector<16x16xf32>
    "tpu.trace_stop"() : () -> ()
    %50 = vector.shape_cast %40 : vector<16x16xf32> to vector<1x16x16xf32>
    %51 = vector.shape_cast %43 : vector<16x16xf32> to vector<1x16x16xf32>
    %52 = vector.shape_cast %46 : vector<16x16xf32> to vector<1x16x16xf32>
    %53 = vector.shape_cast %49 : vector<16x16xf32> to vector<1x16x16xf32>
    %54 = tpu.concatenate %50, %51, %52, %53 in 0 : vector<1x16x16xf32>, vector<1x16x16xf32>, vector<1x16x16xf32>, vector<1x16x16xf32> -> vector<4x16x16xf32>
    %55 = arith.addf %54, %3 : vector<4x16x16xf32>
    %cst_22 = arith.constant dense<0xFF800000> : vector<4x16xf32>
    %56 = vector.multi_reduction <maximumf>, %55, %cst_22 [2] : vector<4x16x16xf32> to vector<4x16xf32>
    %57 = vector.shape_cast %56 : vector<4x16xf32> to vector<4x16x1xf32>
    %58 = vector.broadcast %57 : vector<4x16x1xf32> to vector<4x16x16xf32>
    %59 = arith.subf %55, %58 : vector<4x16x16xf32>
    %60 = math.exp %59 : vector<4x16x16xf32>
    %cst_23 = arith.constant dense<0.000000e+00> : vector<4x16xf32>
    %61 = vector.multi_reduction <add>, %60, %cst_23 [2] : vector<4x16x16xf32> to vector<4x16xf32>
    %62 = vector.shape_cast %61 : vector<4x16xf32> to vector<4x16x1xf32>
    %63 = tpu.reciprocal %62 {approx = true} : vector<4x16x1xf32> -> vector<4x16x1xf32>
    %64 = vector.broadcast %63 : vector<4x16x1xf32> to vector<4x16x16xf32>
    %65 = arith.mulf %60, %64 : vector<4x16x16xf32>
    %66 = arith.truncf %65 : vector<4x16x16xf32> to vector<4x16x16xbf16>
    %67 = vector.extract_strided_slice %37 {offsets = [0, 64], sizes = [16, 8], strides = [1, 1]} : vector<16x96xbf16> to vector<16x8xbf16>
    %68 = vector.extract_strided_slice %66 {offsets = [0, 0, 0], sizes = [1, 16, 16], strides = [1, 1, 1]} : vector<4x16x16xbf16> to vector<1x16x16xbf16>
    %69 = vector.shape_cast %68 : vector<1x16x16xbf16> to vector<16x16xbf16>
    %cst_24 = arith.constant dense<0.000000e+00> : vector<16x8xf32>
    %70 = tpu.matmul %69, %67, %cst_24 {dimension_numbers = #tpu.dot_dimension_numbers<[1], [0], [0], [1], [0, 0, 1, 1], [], []>} : vector<16x16xbf16>, vector<16x8xbf16>, vector<16x8xf32> -> vector<16x8xf32>
    %71 = vector.extract_strided_slice %37 {offsets = [0, 72], sizes = [16, 8], strides = [1, 1]} : vector<16x96xbf16> to vector<16x8xbf16>
    %72 = vector.extract_strided_slice %66 {offsets = [1, 0, 0], sizes = [1, 16, 16], strides = [1, 1, 1]} : vector<4x16x16xbf16> to vector<1x16x16xbf16>
    %73 = vector.shape_cast %72 : vector<1x16x16xbf16> to vector<16x16xbf16>
    %cst_25 = arith.constant dense<0.000000e+00> : vector<16x8xf32>
    %74 = tpu.matmul %73, %71, %cst_25 {dimension_numbers = #tpu.dot_dimension_numbers<[1], [0], [0], [1], [0, 0, 1, 1], [], []>} : vector<16x16xbf16>, vector<16x8xbf16>, vector<16x8xf32> -> vector<16x8xf32>
    %75 = vector.extract_strided_slice %37 {offsets = [0, 80], sizes = [16, 8], strides = [1, 1]} : vector<16x96xbf16> to vector<16x8xbf16>
    %76 = vector.extract_strided_slice %66 {offsets = [2, 0, 0], sizes = [1, 16, 16], strides = [1, 1, 1]} : vector<4x16x16xbf16> to vector<1x16x16xbf16>
    %77 = vector.shape_cast %76 : vector<1x16x16xbf16> to vector<16x16xbf16>
    %cst_26 = arith.constant dense<0.000000e+00> : vector<16x8xf32>
    %78 = tpu.matmul %77, %75, %cst_26 {dimension_numbers = #tpu.dot_dimension_numbers<[1], [0], [0], [1], [0, 0, 1, 1], [], []>} : vector<16x16xbf16>, vector<16x8xbf16>, vector<16x8xf32> -> vector<16x8xf32>
    %79 = vector.extract_strided_slice %37 {offsets = [0, 88], sizes = [16, 8], strides = [1, 1]} : vector<16x96xbf16> to vector<16x8xbf16>
    %80 = vector.extract_strided_slice %66 {offsets = [3, 0, 0], sizes = [1, 16, 16], strides = [1, 1, 1]} : vector<4x16x16xbf16> to vector<1x16x16xbf16>
    %81 = vector.shape_cast %80 : vector<1x16x16xbf16> to vector<16x16xbf16>
    %cst_27 = arith.constant dense<0.000000e+00> : vector<16x8xf32>
    %82 = tpu.matmul %81, %79, %cst_27 {dimension_numbers = #tpu.dot_dimension_numbers<[1], [0], [0], [1], [0, 0, 1, 1], [], []>} : vector<16x16xbf16>, vector<16x8xbf16>, vector<16x8xf32> -> vector<16x8xf32>
    %83 = tpu.concatenate %70, %74, %78, %82 in 1 : vector<16x8xf32>, vector<16x8xf32>, vector<16x8xf32>, vector<16x8xf32> -> vector<16x32xf32>
    %84 = arith.truncf %83 : vector<16x32xf32> to vector<16x32xbf16>
    %c0_28 = arith.constant 0 : index
    %c0_29 = arith.constant 0 : index
    %c0_30 = arith.constant 0 : index
    %85 = vector.load %arg6[%c0_28, %c0_29, %c0_30] : memref<2x32x32xbf16, #tpu.memory_space<vmem>>, vector<1x32x32xbf16>
    %86 = vector.shape_cast %85 : vector<1x32x32xbf16> to vector<32x32xbf16>
    %cst_31 = arith.constant dense<0.000000e+00> : vector<16x32xf32>
    %87 = tpu.matmul %84, %86, %cst_31 {dimension_numbers = #tpu.dot_dimension_numbers<[1], [0], [0], [1], [0, 0, 1, 1], [], []>} : vector<16x32xbf16>, vector<32x32xbf16>, vector<16x32xf32> -> vector<16x32xf32>
    %c0_32 = arith.constant 0 : index
    %c0_33 = arith.constant 0 : index
    %c0_34 = arith.constant 0 : index
    %88 = vector.load %arg7[%c0_32, %c0_33, %c0_34] : memref<2x1x32xf32, #tpu.memory_space<vmem>>, vector<1x1x32xf32>
    %89 = vector.shape_cast %88 : vector<1x1x32xf32> to vector<1x32xf32>
    %90 = vector.broadcast %89 : vector<1x32xf32> to vector<16x32xf32>
    %91 = arith.addf %87, %90 : vector<16x32xf32>
    %92 = arith.addf %28, %91 : vector<16x32xf32>
    %c0_35 = arith.constant 0 : index
    %c0_36 = arith.constant 0 : index
    %c0_37 = arith.constant 0 : index
    %93 = vector.load %arg8[%c0_35, %c0_36, %c0_37] : memref<2x1x32xf32, #tpu.memory_space<vmem>>, vector<1x1x32xf32>
    %94 = vector.shape_cast %93 : vector<1x1x32xf32> to vector<1x32xf32>
    %c0_38 = arith.constant 0 : index
    %c0_39 = arith.constant 0 : index
    %c0_40 = arith.constant 0 : index
    %95 = vector.load %arg9[%c0_38, %c0_39, %c0_40] : memref<2x1x32xf32, #tpu.memory_space<vmem>>, vector<1x1x32xf32>
    %96 = vector.shape_cast %95 : vector<1x1x32xf32> to vector<1x32xf32>
    %cst_41 = arith.constant dense<0.000000e+00> : vector<16xf32>
    %97 = vector.multi_reduction <add>, %92, %cst_41 [1] : vector<16x32xf32> to vector<16xf32>
    %98 = vector.shape_cast %97 : vector<16xf32> to vector<16x1xf32>
    %cst_42 = arith.constant 3.200000e+01 : f32
    %99 = vector.broadcast %cst_42 : f32 to vector<16x1xf32>
    %100 = arith.divf %98, %99 : vector<16x1xf32>
    %101 = vector.broadcast %100 : vector<16x1xf32> to vector<16x32xf32>
    %102 = arith.subf %92, %101 : vector<16x32xf32>
    %103 = arith.mulf %102, %102 : vector<16x32xf32>
    %cst_43 = arith.constant dense<0.000000e+00> : vector<16xf32>
    %104 = vector.multi_reduction <add>, %103, %cst_43 [1] : vector<16x32xf32> to vector<16xf32>
    %105 = vector.shape_cast %104 : vector<16xf32> to vector<16x1xf32>
    %cst_44 = arith.constant 3.200000e+01 : f32
    %106 = vector.broadcast %cst_44 : f32 to vector<16x1xf32>
    %107 = arith.divf %105, %106 : vector<16x1xf32>
    %108 = vector.broadcast %100 : vector<16x1xf32> to vector<16x32xf32>
    %109 = arith.subf %92, %108 : vector<16x32xf32>
    %cst_45 = arith.constant 9.99999996E-13 : f32
    %110 = vector.broadcast %cst_45 : f32 to vector<16x1xf32>
    %111 = arith.addf %107, %110 : vector<16x1xf32>
    %112 = math.rsqrt %111 : vector<16x1xf32>
    %113 = vector.broadcast %112 : vector<16x1xf32> to vector<16x32xf32>
    %114 = arith.mulf %109, %113 : vector<16x32xf32>
    %115 = vector.broadcast %94 : vector<1x32xf32> to vector<16x32xf32>
    %116 = arith.mulf %114, %115 : vector<16x32xf32>
    %117 = vector.broadcast %96 : vector<1x32xf32> to vector<16x32xf32>
    %118 = arith.addf %116, %117 : vector<16x32xf32>
    %119 = arith.truncf %118 : vector<16x32xf32> to vector<16x32xbf16>
    %c0_46 = arith.constant 0 : index
    %c0_47 = arith.constant 0 : index
    %c0_48 = arith.constant 0 : index
    %120 = vector.load %arg10[%c0_46, %c0_47, %c0_48] : memref<2x32x64xbf16, #tpu.memory_space<vmem>>, vector<1x32x64xbf16>
    %121 = vector.shape_cast %120 : vector<1x32x64xbf16> to vector<32x64xbf16>
    %cst_49 = arith.constant dense<0.000000e+00> : vector<16x64xf32>
    %122 = tpu.matmul %119, %121, %cst_49 {dimension_numbers = #tpu.dot_dimension_numbers<[1], [0], [0], [1], [0, 0, 1, 1], [], []>} : vector<16x32xbf16>, vector<32x64xbf16>, vector<16x64xf32> -> vector<16x64xf32>
    %c0_50 = arith.constant 0 : index
    %c0_51 = arith.constant 0 : index
    %c0_52 = arith.constant 0 : index
    %123 = vector.load %arg11[%c0_50, %c0_51, %c0_52] : memref<2x1x64xf32, #tpu.memory_space<vmem>>, vector<1x1x64xf32>
    %124 = vector.shape_cast %123 : vector<1x1x64xf32> to vector<1x64xf32>
    %125 = vector.broadcast %124 : vector<1x64xf32> to vector<16x64xf32>
    %126 = arith.addf %122, %125 : vector<16x64xf32>
    %127 = arith.mulf %126, %126 : vector<16x64xf32>
    %128 = arith.mulf %126, %127 : vector<16x64xf32>
    %cst_53 = arith.constant 4.471500e-02 : f32
    %129 = vector.broadcast %cst_53 : f32 to vector<16x64xf32>
    %130 = arith.mulf %129, %128 : vector<16x64xf32>
    %131 = arith.addf %126, %130 : vector<16x64xf32>
    %cst_54 = arith.constant 0.797884583 : f32
    %132 = vector.broadcast %cst_54 : f32 to vector<16x64xf32>
    %133 = arith.mulf %132, %131 : vector<16x64xf32>
    %134 = math.tanh %133 : vector<16x64xf32>
    %cst_55 = arith.constant 1.000000e+00 : f32
    %135 = vector.broadcast %cst_55 : f32 to vector<16x64xf32>
    %136 = arith.addf %135, %134 : vector<16x64xf32>
    %cst_56 = arith.constant 5.000000e-01 : f32
    %137 = vector.broadcast %cst_56 : f32 to vector<16x64xf32>
    %138 = arith.mulf %137, %136 : vector<16x64xf32>
    %139 = arith.mulf %126, %138 : vector<16x64xf32>
    %140 = arith.truncf %139 : vector<16x64xf32> to vector<16x64xbf16>
    %c0_57 = arith.constant 0 : index
    %c0_58 = arith.constant 0 : index
    %c0_59 = arith.constant 0 : index
    %141 = vector.load %arg12[%c0_57, %c0_58, %c0_59] : memref<2x64x32xbf16, #tpu.memory_space<vmem>>, vector<1x64x32xbf16>
    %142 = vector.shape_cast %141 : vector<1x64x32xbf16> to vector<64x32xbf16>
    %cst_60 = arith.constant dense<0.000000e+00> : vector<16x32xf32>
    %143 = tpu.matmul %140, %142, %cst_60 {dimension_numbers = #tpu.dot_dimension_numbers<[1], [0], [0], [1], [0, 0, 1, 1], [], []>} : vector<16x64xbf16>, vector<64x32xbf16>, vector<16x32xf32> -> vector<16x32xf32>
    %c0_61 = arith.constant 0 : index
    %c0_62 = arith.constant 0 : index
    %c0_63 = arith.constant 0 : index
    %144 = vector.load %arg13[%c0_61, %c0_62, %c0_63] : memref<2x1x32xf32, #tpu.memory_space<vmem>>, vector<1x1x32xf32>
    %145 = vector.shape_cast %144 : vector<1x1x32xf32> to vector<1x32xf32>
    %146 = vector.broadcast %145 : vector<1x32xf32> to vector<16x32xf32>
    %147 = arith.addf %143, %146 : vector<16x32xf32>
    %148 = arith.addf %118, %147 : vector<16x32xf32>
    %c0_64 = arith.constant 0 : index
    %c0_65 = arith.constant 0 : index
    %c0_66 = arith.constant 0 : index
    %149 = vector.load %arg14[%c0_64, %c0_65, %c0_66] : memref<2x1x32xf32, #tpu.memory_space<vmem>>, vector<1x1x32xf32>
    %150 = vector.shape_cast %149 : vector<1x1x32xf32> to vector<1x32xf32>
    %c0_67 = arith.constant 0 : index
    %c0_68 = arith.constant 0 : index
    %c0_69 = arith.constant 0 : index
    %151 = vector.load %arg15[%c0_67, %c0_68, %c0_69] : memref<2x1x32xf32, #tpu.memory_space<vmem>>, vector<1x1x32xf32>
    %152 = vector.shape_cast %151 : vector<1x1x32xf32> to vector<1x32xf32>
    %cst_70 = arith.constant dense<0.000000e+00> : vector<16xf32>
    %153 = vector.multi_reduction <add>, %148, %cst_70 [1] : vector<16x32xf32> to vector<16xf32>
    %154 = vector.shape_cast %153 : vector<16xf32> to vector<16x1xf32>
    %cst_71 = arith.constant 3.200000e+01 : f32
    %155 = vector.broadcast %cst_71 : f32 to vector<16x1xf32>
    %156 = arith.divf %154, %155 : vector<16x1xf32>
    %157 = vector.broadcast %156 : vector<16x1xf32> to vector<16x32xf32>
    %158 = arith.subf %148, %157 : vector<16x32xf32>
    %159 = arith.mulf %158, %158 : vector<16x32xf32>
    %cst_72 = arith.constant dense<0.000000e+00> : vector<16xf32>
    %160 = vector.multi_reduction <add>, %159, %cst_72 [1] : vector<16x32xf32> to vector<16xf32>
    %161 = vector.shape_cast %160 : vector<16xf32> to vector<16x1xf32>
    %cst_73 = arith.constant 3.200000e+01 : f32
    %162 = vector.broadcast %cst_73 : f32 to vector<16x1xf32>
    %163 = arith.divf %161, %162 : vector<16x1xf32>
    %164 = vector.broadcast %156 : vector<16x1xf32> to vector<16x32xf32>
    %165 = arith.subf %148, %164 : vector<16x32xf32>
    %cst_74 = arith.constant 9.99999996E-13 : f32
    %166 = vector.broadcast %cst_74 : f32 to vector<16x1xf32>
    %167 = arith.addf %163, %166 : vector<16x1xf32>
    %168 = math.rsqrt %167 : vector<16x1xf32>
    %169 = vector.broadcast %168 : vector<16x1xf32> to vector<16x32xf32>
    %170 = arith.mulf %165, %169 : vector<16x32xf32>
    %171 = vector.broadcast %150 : vector<1x32xf32> to vector<16x32xf32>
    %172 = arith.mulf %170, %171 : vector<16x32xf32>
    %173 = vector.broadcast %152 : vector<1x32xf32> to vector<16x32xf32>
    %174 = arith.addf %172, %173 : vector<16x32xf32>
    %175 = arith.truncf %174 : vector<16x32xf32> to vector<16x32xbf16>
    %c1 = arith.constant 1 : index
    %c0_75 = arith.constant 0 : index
    %c0_76 = arith.constant 0 : index
    %176 = vector.load %arg4[%c1, %c0_75, %c0_76] : memref<2x32x96xbf16, #tpu.memory_space<vmem>>, vector<1x32x96xbf16>
    %177 = vector.shape_cast %176 : vector<1x32x96xbf16> to vector<32x96xbf16>
    %cst_77 = arith.constant dense<0.000000e+00> : vector<16x96xf32>
    %178 = tpu.matmul %175, %177, %cst_77 {dimension_numbers = #tpu.dot_dimension_numbers<[1], [0], [0], [1], [0, 0, 1, 1], [], []>} : vector<16x32xbf16>, vector<32x96xbf16>, vector<16x96xf32> -> vector<16x96xf32>
    %c1_78 = arith.constant 1 : index
    %c0_79 = arith.constant 0 : index
    %c0_80 = arith.constant 0 : index
    %179 = vector.load %arg5[%c1_78, %c0_79, %c0_80] : memref<2x1x96xf32, #tpu.memory_space<vmem>>, vector<1x1x96xf32>
    %180 = vector.shape_cast %179 : vector<1x1x96xf32> to vector<1x96xf32>
    %181 = vector.broadcast %180 : vector<1x96xf32> to vector<16x96xf32>
    %182 = arith.addf %178, %181 : vector<16x96xf32>
    %183 = arith.truncf %182 : vector<16x96xf32> to vector<16x96xbf16>
    %184 = vector.extract_strided_slice %183 {offsets = [0, 0], sizes = [16, 8], strides = [1, 1]} : vector<16x96xbf16> to vector<16x8xbf16>
    %185 = vector.extract_strided_slice %183 {offsets = [0, 32], sizes = [16, 8], strides = [1, 1]} : vector<16x96xbf16> to vector<16x8xbf16>
    "tpu.trace_start"() <{level = 10 : i32, message = "nd,md->nm"}> : () -> ()
    %cst_81 = arith.constant dense<0.000000e+00> : vector<16x16xf32>
    %186 = tpu.matmul %184, %185, %cst_81 {dimension_numbers = #tpu.dot_dimension_numbers<[1], [1], [0], [0], [0, 0, 1, 0], [], []>} : vector<16x8xbf16>, vector<16x8xbf16>, vector<16x16xf32> -> vector<16x16xf32>
    "tpu.trace_stop"() : () -> ()
    %187 = vector.extract_strided_slice %183 {offsets = [0, 8], sizes = [16, 8], strides = [1, 1]} : vector<16x96xbf16> to vector<16x8xbf16>
    %188 = vector.extract_strided_slice %183 {offsets = [0, 40], sizes = [16, 8], strides = [1, 1]} : vector<16x96xbf16> to vector<16x8xbf16>
    "tpu.trace_start"() <{level = 10 : i32, message = "nd,md->nm"}> : () -> ()
    %cst_82 = arith.constant dense<0.000000e+00> : vector<16x16xf32>
    %189 = tpu.matmul %187, %188, %cst_82 {dimension_numbers = #tpu.dot_dimension_numbers<[1], [1], [0], [0], [0, 0, 1, 0], [], []>} : vector<16x8xbf16>, vector<16x8xbf16>, vector<16x16xf32> -> vector<16x16xf32>
    "tpu.trace_stop"() : () -> ()
    %190 = vector.extract_strided_slice %183 {offsets = [0, 16], sizes = [16, 8], strides = [1, 1]} : vector<16x96xbf16> to vector<16x8xbf16>
    %191 = vector.extract_strided_slice %183 {offsets = [0, 48], sizes = [16, 8], strides = [1, 1]} : vector<16x96xbf16> to vector<16x8xbf16>
    "tpu.trace_start"() <{level = 10 : i32, message = "nd,md->nm"}> : () -> ()
    %cst_83 = arith.constant dense<0.000000e+00> : vector<16x16xf32>
    %192 = tpu.matmul %190, %191, %cst_83 {dimension_numbers = #tpu.dot_dimension_numbers<[1], [1], [0], [0], [0, 0, 1, 0], [], []>} : vector<16x8xbf16>, vector<16x8xbf16>, vector<16x16xf32> -> vector<16x16xf32>
    "tpu.trace_stop"() : () -> ()
    %193 = vector.extract_strided_slice %183 {offsets = [0, 24], sizes = [16, 8], strides = [1, 1]} : vector<16x96xbf16> to vector<16x8xbf16>
    %194 = vector.extract_strided_slice %183 {offsets = [0, 56], sizes = [16, 8], strides = [1, 1]} : vector<16x96xbf16> to vector<16x8xbf16>
    "tpu.trace_start"() <{level = 10 : i32, message = "nd,md->nm"}> : () -> ()
    %cst_84 = arith.constant dense<0.000000e+00> : vector<16x16xf32>
    %195 = tpu.matmul %193, %194, %cst_84 {dimension_numbers = #tpu.dot_dimension_numbers<[1], [1], [0], [0], [0, 0, 1, 0], [], []>} : vector<16x8xbf16>, vector<16x8xbf16>, vector<16x16xf32> -> vector<16x16xf32>
    "tpu.trace_stop"() : () -> ()
    %196 = vector.shape_cast %186 : vector<16x16xf32> to vector<1x16x16xf32>
    %197 = vector.shape_cast %189 : vector<16x16xf32> to vector<1x16x16xf32>
    %198 = vector.shape_cast %192 : vector<16x16xf32> to vector<1x16x16xf32>
    %199 = vector.shape_cast %195 : vector<16x16xf32> to vector<1x16x16xf32>
    %200 = tpu.concatenate %196, %197, %198, %199 in 0 : vector<1x16x16xf32>, vector<1x16x16xf32>, vector<1x16x16xf32>, vector<1x16x16xf32> -> vector<4x16x16xf32>
    %201 = arith.addf %200, %3 : vector<4x16x16xf32>
    %cst_85 = arith.constant dense<0xFF800000> : vector<4x16xf32>
    %202 = vector.multi_reduction <maximumf>, %201, %cst_85 [2] : vector<4x16x16xf32> to vector<4x16xf32>
    %203 = vector.shape_cast %202 : vector<4x16xf32> to vector<4x16x1xf32>
    %204 = vector.broadcast %203 : vector<4x16x1xf32> to vector<4x16x16xf32>
    %205 = arith.subf %201, %204 : vector<4x16x16xf32>
    %206 = math.exp %205 : vector<4x16x16xf32>
    %cst_86 = arith.constant dense<0.000000e+00> : vector<4x16xf32>
    %207 = vector.multi_reduction <add>, %206, %cst_86 [2] : vector<4x16x16xf32> to vector<4x16xf32>
    %208 = vector.shape_cast %207 : vector<4x16xf32> to vector<4x16x1xf32>
    %209 = tpu.reciprocal %208 {approx = true} : vector<4x16x1xf32> -> vector<4x16x1xf32>
    %210 = vector.broadcast %209 : vector<4x16x1xf32> to vector<4x16x16xf32>
    %211 = arith.mulf %206, %210 : vector<4x16x16xf32>
    %212 = arith.truncf %211 : vector<4x16x16xf32> to vector<4x16x16xbf16>
    %213 = vector.extract_strided_slice %183 {offsets = [0, 64], sizes = [16, 8], strides = [1, 1]} : vector<16x96xbf16> to vector<16x8xbf16>
    %214 = vector.extract_strided_slice %212 {offsets = [0, 0, 0], sizes = [1, 16, 16], strides = [1, 1, 1]} : vector<4x16x16xbf16> to vector<1x16x16xbf16>
    %215 = vector.shape_cast %214 : vector<1x16x16xbf16> to vector<16x16xbf16>
    %cst_87 = arith.constant dense<0.000000e+00> : vector<16x8xf32>
    %216 = tpu.matmul %215, %213, %cst_87 {dimension_numbers = #tpu.dot_dimension_numbers<[1], [0], [0], [1], [0, 0, 1, 1], [], []>} : vector<16x16xbf16>, vector<16x8xbf16>, vector<16x8xf32> -> vector<16x8xf32>
    %217 = vector.extract_strided_slice %183 {offsets = [0, 72], sizes = [16, 8], strides = [1, 1]} : vector<16x96xbf16> to vector<16x8xbf16>
    %218 = vector.extract_strided_slice %212 {offsets = [1, 0, 0], sizes = [1, 16, 16], strides = [1, 1, 1]} : vector<4x16x16xbf16> to vector<1x16x16xbf16>
    %219 = vector.shape_cast %218 : vector<1x16x16xbf16> to vector<16x16xbf16>
    %cst_88 = arith.constant dense<0.000000e+00> : vector<16x8xf32>
    %220 = tpu.matmul %219, %217, %cst_88 {dimension_numbers = #tpu.dot_dimension_numbers<[1], [0], [0], [1], [0, 0, 1, 1], [], []>} : vector<16x16xbf16>, vector<16x8xbf16>, vector<16x8xf32> -> vector<16x8xf32>
    %221 = vector.extract_strided_slice %183 {offsets = [0, 80], sizes = [16, 8], strides = [1, 1]} : vector<16x96xbf16> to vector<16x8xbf16>
    %222 = vector.extract_strided_slice %212 {offsets = [2, 0, 0], sizes = [1, 16, 16], strides = [1, 1, 1]} : vector<4x16x16xbf16> to vector<1x16x16xbf16>
    %223 = vector.shape_cast %222 : vector<1x16x16xbf16> to vector<16x16xbf16>
    %cst_89 = arith.constant dense<0.000000e+00> : vector<16x8xf32>
    %224 = tpu.matmul %223, %221, %cst_89 {dimension_numbers = #tpu.dot_dimension_numbers<[1], [0], [0], [1], [0, 0, 1, 1], [], []>} : vector<16x16xbf16>, vector<16x8xbf16>, vector<16x8xf32> -> vector<16x8xf32>
    %225 = vector.extract_strided_slice %183 {offsets = [0, 88], sizes = [16, 8], strides = [1, 1]} : vector<16x96xbf16> to vector<16x8xbf16>
    %226 = vector.extract_strided_slice %212 {offsets = [3, 0, 0], sizes = [1, 16, 16], strides = [1, 1, 1]} : vector<4x16x16xbf16> to vector<1x16x16xbf16>
    %227 = vector.shape_cast %226 : vector<1x16x16xbf16> to vector<16x16xbf16>
    %cst_90 = arith.constant dense<0.000000e+00> : vector<16x8xf32>
    %228 = tpu.matmul %227, %225, %cst_90 {dimension_numbers = #tpu.dot_dimension_numbers<[1], [0], [0], [1], [0, 0, 1, 1], [], []>} : vector<16x16xbf16>, vector<16x8xbf16>, vector<16x8xf32> -> vector<16x8xf32>
    %229 = tpu.concatenate %216, %220, %224, %228 in 1 : vector<16x8xf32>, vector<16x8xf32>, vector<16x8xf32>, vector<16x8xf32> -> vector<16x32xf32>
    %230 = arith.truncf %229 : vector<16x32xf32> to vector<16x32xbf16>
    %c1_91 = arith.constant 1 : index
    %c0_92 = arith.constant 0 : index
    %c0_93 = arith.constant 0 : index
    %231 = vector.load %arg6[%c1_91, %c0_92, %c0_93] : memref<2x32x32xbf16, #tpu.memory_space<vmem>>, vector<1x32x32xbf16>
    %232 = vector.shape_cast %231 : vector<1x32x32xbf16> to vector<32x32xbf16>
    %cst_94 = arith.constant dense<0.000000e+00> : vector<16x32xf32>
    %233 = tpu.matmul %230, %232, %cst_94 {dimension_numbers = #tpu.dot_dimension_numbers<[1], [0], [0], [1], [0, 0, 1, 1], [], []>} : vector<16x32xbf16>, vector<32x32xbf16>, vector<16x32xf32> -> vector<16x32xf32>
    %c1_95 = arith.constant 1 : index
    %c0_96 = arith.constant 0 : index
    %c0_97 = arith.constant 0 : index
    %234 = vector.load %arg7[%c1_95, %c0_96, %c0_97] : memref<2x1x32xf32, #tpu.memory_space<vmem>>, vector<1x1x32xf32>
    %235 = vector.shape_cast %234 : vector<1x1x32xf32> to vector<1x32xf32>
    %236 = vector.broadcast %235 : vector<1x32xf32> to vector<16x32xf32>
    %237 = arith.addf %233, %236 : vector<16x32xf32>
    %238 = arith.addf %174, %237 : vector<16x32xf32>
    %c1_98 = arith.constant 1 : index
    %c0_99 = arith.constant 0 : index
    %c0_100 = arith.constant 0 : index
    %239 = vector.load %arg8[%c1_98, %c0_99, %c0_100] : memref<2x1x32xf32, #tpu.memory_space<vmem>>, vector<1x1x32xf32>
    %240 = vector.shape_cast %239 : vector<1x1x32xf32> to vector<1x32xf32>
    %c1_101 = arith.constant 1 : index
    %c0_102 = arith.constant 0 : index
    %c0_103 = arith.constant 0 : index
    %241 = vector.load %arg9[%c1_101, %c0_102, %c0_103] : memref<2x1x32xf32, #tpu.memory_space<vmem>>, vector<1x1x32xf32>
    %242 = vector.shape_cast %241 : vector<1x1x32xf32> to vector<1x32xf32>
    %cst_104 = arith.constant dense<0.000000e+00> : vector<16xf32>
    %243 = vector.multi_reduction <add>, %238, %cst_104 [1] : vector<16x32xf32> to vector<16xf32>
    %244 = vector.shape_cast %243 : vector<16xf32> to vector<16x1xf32>
    %cst_105 = arith.constant 3.200000e+01 : f32
    %245 = vector.broadcast %cst_105 : f32 to vector<16x1xf32>
    %246 = arith.divf %244, %245 : vector<16x1xf32>
    %247 = vector.broadcast %246 : vector<16x1xf32> to vector<16x32xf32>
    %248 = arith.subf %238, %247 : vector<16x32xf32>
    %249 = arith.mulf %248, %248 : vector<16x32xf32>
    %cst_106 = arith.constant dense<0.000000e+00> : vector<16xf32>
    %250 = vector.multi_reduction <add>, %249, %cst_106 [1] : vector<16x32xf32> to vector<16xf32>
    %251 = vector.shape_cast %250 : vector<16xf32> to vector<16x1xf32>
    %cst_107 = arith.constant 3.200000e+01 : f32
    %252 = vector.broadcast %cst_107 : f32 to vector<16x1xf32>
    %253 = arith.divf %251, %252 : vector<16x1xf32>
    %254 = vector.broadcast %246 : vector<16x1xf32> to vector<16x32xf32>
    %255 = arith.subf %238, %254 : vector<16x32xf32>
    %cst_108 = arith.constant 9.99999996E-13 : f32
    %256 = vector.broadcast %cst_108 : f32 to vector<16x1xf32>
    %257 = arith.addf %253, %256 : vector<16x1xf32>
    %258 = math.rsqrt %257 : vector<16x1xf32>
    %259 = vector.broadcast %258 : vector<16x1xf32> to vector<16x32xf32>
    %260 = arith.mulf %255, %259 : vector<16x32xf32>
    %261 = vector.broadcast %240 : vector<1x32xf32> to vector<16x32xf32>
    %262 = arith.mulf %260, %261 : vector<16x32xf32>
    %263 = vector.broadcast %242 : vector<1x32xf32> to vector<16x32xf32>
    %264 = arith.addf %262, %263 : vector<16x32xf32>
    %265 = arith.truncf %264 : vector<16x32xf32> to vector<16x32xbf16>
    %c1_109 = arith.constant 1 : index
    %c0_110 = arith.constant 0 : index
    %c0_111 = arith.constant 0 : index
    %266 = vector.load %arg10[%c1_109, %c0_110, %c0_111] : memref<2x32x64xbf16, #tpu.memory_space<vmem>>, vector<1x32x64xbf16>
    %267 = vector.shape_cast %266 : vector<1x32x64xbf16> to vector<32x64xbf16>
    %cst_112 = arith.constant dense<0.000000e+00> : vector<16x64xf32>
    %268 = tpu.matmul %265, %267, %cst_112 {dimension_numbers = #tpu.dot_dimension_numbers<[1], [0], [0], [1], [0, 0, 1, 1], [], []>} : vector<16x32xbf16>, vector<32x64xbf16>, vector<16x64xf32> -> vector<16x64xf32>
    %c1_113 = arith.constant 1 : index
    %c0_114 = arith.constant 0 : index
    %c0_115 = arith.constant 0 : index
    %269 = vector.load %arg11[%c1_113, %c0_114, %c0_115] : memref<2x1x64xf32, #tpu.memory_space<vmem>>, vector<1x1x64xf32>
    %270 = vector.shape_cast %269 : vector<1x1x64xf32> to vector<1x64xf32>
    %271 = vector.broadcast %270 : vector<1x64xf32> to vector<16x64xf32>
    %272 = arith.addf %268, %271 : vector<16x64xf32>
    %273 = arith.mulf %272, %272 : vector<16x64xf32>
    %274 = arith.mulf %272, %273 : vector<16x64xf32>
    %cst_116 = arith.constant 4.471500e-02 : f32
    %275 = vector.broadcast %cst_116 : f32 to vector<16x64xf32>
    %276 = arith.mulf %275, %274 : vector<16x64xf32>
    %277 = arith.addf %272, %276 : vector<16x64xf32>
    %cst_117 = arith.constant 0.797884583 : f32
    %278 = vector.broadcast %cst_117 : f32 to vector<16x64xf32>
    %279 = arith.mulf %278, %277 : vector<16x64xf32>
    %280 = math.tanh %279 : vector<16x64xf32>
    %cst_118 = arith.constant 1.000000e+00 : f32
    %281 = vector.broadcast %cst_118 : f32 to vector<16x64xf32>
    %282 = arith.addf %281, %280 : vector<16x64xf32>
    %cst_119 = arith.constant 5.000000e-01 : f32
    %283 = vector.broadcast %cst_119 : f32 to vector<16x64xf32>
    %284 = arith.mulf %283, %282 : vector<16x64xf32>
    %285 = arith.mulf %272, %284 : vector<16x64xf32>
    %286 = arith.truncf %285 : vector<16x64xf32> to vector<16x64xbf16>
    %c1_120 = arith.constant 1 : index
    %c0_121 = arith.constant 0 : index
    %c0_122 = arith.constant 0 : index
    %287 = vector.load %arg12[%c1_120, %c0_121, %c0_122] : memref<2x64x32xbf16, #tpu.memory_space<vmem>>, vector<1x64x32xbf16>
    %288 = vector.shape_cast %287 : vector<1x64x32xbf16> to vector<64x32xbf16>
    %cst_123 = arith.constant dense<0.000000e+00> : vector<16x32xf32>
    %289 = tpu.matmul %286, %288, %cst_123 {dimension_numbers = #tpu.dot_dimension_numbers<[1], [0], [0], [1], [0, 0, 1, 1], [], []>} : vector<16x64xbf16>, vector<64x32xbf16>, vector<16x32xf32> -> vector<16x32xf32>
    %c1_124 = arith.constant 1 : index
    %c0_125 = arith.constant 0 : index
    %c0_126 = arith.constant 0 : index
    %290 = vector.load %arg13[%c1_124, %c0_125, %c0_126] : memref<2x1x32xf32, #tpu.memory_space<vmem>>, vector<1x1x32xf32>
    %291 = vector.shape_cast %290 : vector<1x1x32xf32> to vector<1x32xf32>
    %292 = vector.broadcast %291 : vector<1x32xf32> to vector<16x32xf32>
    %293 = arith.addf %289, %292 : vector<16x32xf32>
    %294 = arith.addf %264, %293 : vector<16x32xf32>
    %c1_127 = arith.constant 1 : index
    %c0_128 = arith.constant 0 : index
    %c0_129 = arith.constant 0 : index
    %295 = vector.load %arg14[%c1_127, %c0_128, %c0_129] : memref<2x1x32xf32, #tpu.memory_space<vmem>>, vector<1x1x32xf32>
    %296 = vector.shape_cast %295 : vector<1x1x32xf32> to vector<1x32xf32>
    %c1_130 = arith.constant 1 : index
    %c0_131 = arith.constant 0 : index
    %c0_132 = arith.constant 0 : index
    %297 = vector.load %arg15[%c1_130, %c0_131, %c0_132] : memref<2x1x32xf32, #tpu.memory_space<vmem>>, vector<1x1x32xf32>
    %298 = vector.shape_cast %297 : vector<1x1x32xf32> to vector<1x32xf32>
    %cst_133 = arith.constant dense<0.000000e+00> : vector<16xf32>
    %299 = vector.multi_reduction <add>, %294, %cst_133 [1] : vector<16x32xf32> to vector<16xf32>
    %300 = vector.shape_cast %299 : vector<16xf32> to vector<16x1xf32>
    %cst_134 = arith.constant 3.200000e+01 : f32
    %301 = vector.broadcast %cst_134 : f32 to vector<16x1xf32>
    %302 = arith.divf %300, %301 : vector<16x1xf32>
    %303 = vector.broadcast %302 : vector<16x1xf32> to vector<16x32xf32>
    %304 = arith.subf %294, %303 : vector<16x32xf32>
    %305 = arith.mulf %304, %304 : vector<16x32xf32>
    %cst_135 = arith.constant dense<0.000000e+00> : vector<16xf32>
    %306 = vector.multi_reduction <add>, %305, %cst_135 [1] : vector<16x32xf32> to vector<16xf32>
    %307 = vector.shape_cast %306 : vector<16xf32> to vector<16x1xf32>
    %cst_136 = arith.constant 3.200000e+01 : f32
    %308 = vector.broadcast %cst_136 : f32 to vector<16x1xf32>
    %309 = arith.divf %307, %308 : vector<16x1xf32>
    %310 = vector.broadcast %302 : vector<16x1xf32> to vector<16x32xf32>
    %311 = arith.subf %294, %310 : vector<16x32xf32>
    %cst_137 = arith.constant 9.99999996E-13 : f32
    %312 = vector.broadcast %cst_137 : f32 to vector<16x1xf32>
    %313 = arith.addf %309, %312 : vector<16x1xf32>
    %314 = math.rsqrt %313 : vector<16x1xf32>
    %315 = vector.broadcast %314 : vector<16x1xf32> to vector<16x32xf32>
    %316 = arith.mulf %311, %315 : vector<16x32xf32>
    %317 = vector.broadcast %296 : vector<1x32xf32> to vector<16x32xf32>
    %318 = arith.mulf %316, %317 : vector<16x32xf32>
    %319 = vector.broadcast %298 : vector<1x32xf32> to vector<16x32xf32>
    %320 = arith.addf %318, %319 : vector<16x32xf32>
    %321 = vector.extract_strided_slice %320 {offsets = [0, 0], sizes = [1, 32], strides = [1, 1]} : vector<16x32xf32> to vector<1x32xf32>
    %322 = vector.extract_strided_slice %320 {offsets = [8, 0], sizes = [1, 32], strides = [1, 1]} : vector<16x32xf32> to vector<1x32xf32>
    %323 = tpu.concatenate %321, %322 in 0 : vector<1x32xf32>, vector<1x32xf32> -> vector<2x32xf32>
    %324 = arith.truncf %323 : vector<2x32xf32> to vector<2x32xbf16>
    %c0_138 = arith.constant 0 : index
    %c0_139 = arith.constant 0 : index
    %325 = vector.load %arg16[%c0_138, %c0_139] : memref<32x32xbf16, #tpu.memory_space<vmem>>, vector<32x32xbf16>
    %cst_140 = arith.constant dense<0.000000e+00> : vector<2x32xf32>
    %326 = tpu.matmul %324, %325, %cst_140 {dimension_numbers = #tpu.dot_dimension_numbers<[1], [0], [0], [1], [0, 0, 1, 1], [], []>} : vector<2x32xbf16>, vector<32x32xbf16>, vector<2x32xf32> -> vector<2x32xf32>
    %c0_141 = arith.constant 0 : index
    %c0_142 = arith.constant 0 : index
    %327 = vector.load %arg17[%c0_141, %c0_142] : memref<1x32xf32, #tpu.memory_space<vmem>>, vector<1x32xf32>
    %328 = vector.broadcast %327 : vector<1x32xf32> to vector<2x32xf32>
    %329 = arith.addf %326, %328 : vector<2x32xf32>
    %330 = math.tanh %329 : vector<2x32xf32>
    %331 = arith.truncf %330 : vector<2x32xf32> to vector<2x32xbf16>
    %c0_143 = arith.constant 0 : index
    %c0_144 = arith.constant 0 : index
    %332 = vector.load %arg18[%c0_143, %c0_144] : memref<32x128xbf16, #tpu.memory_space<vmem>>, vector<32x128xbf16>
    %cst_145 = arith.constant dense<0.000000e+00> : vector<2x128xf32>
    %333 = tpu.matmul %331, %332, %cst_145 {dimension_numbers = #tpu.dot_dimension_numbers<[1], [0], [0], [1], [0, 0, 1, 1], [], []>} : vector<2x32xbf16>, vector<32x128xbf16>, vector<2x128xf32> -> vector<2x128xf32>
    %c0_146 = arith.constant 0 : index
    %c0_147 = arith.constant 0 : index
    %334 = vector.load %arg19[%c0_146, %c0_147] : memref<1x128xf32, #tpu.memory_space<vmem>>, vector<1x128xf32>
    %335 = vector.broadcast %334 : vector<1x128xf32> to vector<2x128xf32>
    %336 = arith.addf %333, %335 : vector<2x128xf32>
    %c0_148 = arith.constant 0 : index
    %c0_149 = arith.constant 0 : index
    %337 = vector.load %arg20[%c0_148, %c0_149] : memref<2x128xf32, #tpu.memory_space<vmem>>, vector<2x128xf32>
    tpu.vector_store %arg20[%c0_148, %c0_149], %336 {strides = array<i32>} : memref<2x128xf32, #tpu.memory_space<vmem>>, vector<2x128xf32>,
    return
  }
}

</mosaic_0001>

<bundles_post_ra>
// kernel: tpu_custom_call.1
= control target key start
LH: loop header
LB: loop body
LE: loop exit
PB: predicated region body
PF: predicated region fallthrough
CT: control target
= control target key end

     0   :  { %s3687_s0 = inlined_call_operand.hbm [shape: f32[16,32], index: 0, kind: input, shape index: {}]   ;;  %s3688_s1 = inlined_call_operand.hbm [shape: f32[16,16], index: 1, kind: input, shape index: {}]   ;;  %s3689_s2 = inlined_call_operand.hbm [shape: f32[1,32], index: 2, kind: input, shape index: {}]   ;;  %s3690_s3 = inlined_call_operand.hbm [shape: f32[1,32], index: 3, kind: input, shape index: {}]   ;;  %s3691_s4 = inlined_call_operand.vmem [shape: bf16[2,32,96], index: 4, kind: input, shape index: {}]   ;;  %s3692_s5 = inlined_call_operand.hbm [shape: f32[2,1,96], index: 5, kind: input, shape index: {}]   ;;  %s3693_s6 = inlined_call_operand.vmem [shape: bf16[2,32,32], index: 6, kind: input, shape index: {}]   ;;  %s3694_s7 = inlined_call_operand.hbm [shape: f32[2,1,32], index: 7, kind: input, shape index: {}]   ;;  %s3695_s8 = inlined_call_operand.hbm [shape: f32[2,1,32], index: 8, kind: input, shape index: {}]   ;;  %s3696_s9 = inlined_call_operand.hbm [shape: f32[2,1,32], index: 9, kind: input, shape index: {}]   ;;  %s3697_s10 = inlined_call_operand.vmem [shape: bf16[2,32,64], index: 10, kind: input, shape index: {}]   ;;  %s3698_s11 = inlined_call_operand.hbm [shape: f32[2,1,64], index: 11, kind: input, shape index: {}]   ;;  %s3699_s12 = inlined_call_operand.vmem [shape: bf16[2,64,32], index: 12, kind: input, shape index: {}]   ;;  %s3700_s13 = inlined_call_operand.hbm [shape: f32[2,1,32], index: 13, kind: input, shape index: {}]   ;;  %s3701_s14 = inlined_call_operand.hbm [shape: f32[2,1,32], index: 14, kind: input, shape index: {}]   ;;  %s3702_s15 = inlined_call_operand.hbm [shape: f32[2,1,32], index: 15, kind: input, shape index: {}]   ;;  %s3703_s16 = inlined_call_operand.vmem [shape: bf16[32,32], index: 16, kind: input, shape index: {}]   ;;  %s3704_s17 = inlined_call_operand.hbm [shape: f32[1,32], index: 17, kind: input, shape index: {}]   ;;  %s3705_s18 = inlined_call_operand.vmem [shape: bf16[32,128], index: 18, kind: input, shape index: {}]   ;;  %s3706_s19 = inlined_call_operand.vmem [shape: f32[1,128], index: 19, kind: input, shape index: {}]   ;;  %s3707_s20 = inlined_call_operand.hbm [shape: f32[2,128], index: 20, kind: output, shape index: {}]  }
   0x1   :  { %3709 = sst [smem:[#allocation32_spill]] %s3687_s0 }
   0x2   :  { %3710 = sst [smem:[#allocation33_spill]] %s3688_s1 }
   0x3   :  { %3711 = sst [smem:[#allocation34_spill]] %s3689_s2 }
   0x4   :  { %3712 = sst [smem:[#allocation35_spill]] %s3690_s3 }
   0x5   :  { %3713 = sst [smem:[#allocation36_spill]] %s3691_s4 }
   0x6   :  { %3714 = sst [smem:[#allocation37_spill]] %s3707_s20 }
   0x7   :  { %25 = vsyncpa [#allocation3], 0 }
   0x8   :  { %26 = vsyncpa [#allocation6], 0 }
   0x9   :  { %27 = vsyncpa [#allocation9], 0 }
   0xa   :  { %28 = vsyncpa [#allocation12], 0 }
   0xb   :  { %29 = vsyncpa [#allocation15], 0 }
   0xc   :  { %30 = vsyncpa [#allocation18], 0 }
   0xd   :  { %31 = vsyncpa [#allocation21], 0 }
   0xe   :  { %32 = vsyncpa [#allocation4], 0  ;;  %s3121_s1 = smov [#allocation5]   ;;  %s3122_s23 = smov [#allocation8]  }
   0xf   :  { %s50_s22 = sshll.u32 %s3121_s1, 4  ;;  %s73_s24 = sshll.u32 %s3122_s23, 4  ;;  %s51_s22 = int_to_ptr.vmem [resolvable:$true] %s50_s22  ;;  %s74_s24 = int_to_ptr.vmem [resolvable:$true] %s73_s24 }
  0x10   :  { %s2833_s2 = scalar_lea.vmem %s51_s22, 256  ;;  %p2838_p1 = scmp.lt.s32.totalorder %s51_s22, %s51_s22 }
  0x11   :  { %p2834_p0 = scmp.ne.s32.totalorder %s51_s22, %s2833_s2  ;;  %p2839_p2 = scmp.lt.s32.totalorder %s2833_s2, %s2833_s2 }
  0x13   :  { %p2840_p3 = por %p2839_p2, %p2838_p1 }
  0x15   :  { %p2841_p4 = pnand %p2840_p3, %p2834_p0 }
  0x17   :  { %2844 = shalt.err (!%p2841_p4)
}
  0x18   :  { %s3123_s25 = smov 128   ;;  %s3124_s3 = smov 8  }
  0x19   :  { %s3715_s28 = sld [smem:[#allocation33_spill]]  ;;  %s2853_s4 = scalar_lea.vmem %s74_s24, 16 }
  0x1a   :  { %p2854_p5 = scmp.ne.s32.totalorder %s74_s24, %s2853_s4  ;;  %s2857_s29 = scalar_lea.vmem %s74_s24, 32 }
  0x1b   :  { %p2858_p6 = scmp.lt.s32.totalorder %s74_s24, %s74_s24  ;;  %p2859_p7 = scmp.lt.s32.totalorder %s2857_s29, %s2853_s4 }
  0x1d   :  { %p2860_p8 = por %p2859_p7, %p2858_p6 }
  0x1f   :  { %56 = dma.hbm_to_vmem [thread:$0]  %s3715_s28, 256, %s51_s22, [#allocation6], %s3123_s25, %s3123_s25, %s3124_s3  }
  0x20   :  { %p2861_p9 = pnand %p2860_p8, %p2854_p5 }
  0x22   :  { %2864 = shalt.err (!%p2861_p9)
}
  0x23   :  { %s3716_s21 = sld [smem:[#allocation35_spill]]  ;;  %s3125_s1 = smov [#allocation11]  }
  0x24   :  { %s98_s23 = sshll.u32 %s3125_s1, 4  ;;  %s3126_s2 = smov [#allocation14]   ;;  %s99_s23 = int_to_ptr.vmem [resolvable:$true] %s98_s23 }
  0x25   :  { %s122_s20 = sshll.u32 %s3126_s2, 4  ;;  %s2873_s26 = scalar_lea.vmem %s99_s23, 32  ;;  %s123_s20 = int_to_ptr.vmem [resolvable:$true] %s122_s20 }
  0x26   :  { %p2874_p10 = scmp.ne.s32.totalorder %s99_s23, %s2873_s26  ;;  %p2878_p11 = scmp.lt.s32.totalorder %s99_s23, %s99_s23 }
  0x27   :  { %p2879_p12 = scmp.lt.s32.totalorder %s2873_s26, %s2873_s26 }
  0x29   :  { %76 = dma.hbm_to_vmem [thread:$0]  %s3716_s21, 16, %s74_s24, [#allocation9]  }
  0x2a   :  { %p2880_p13 = por %p2879_p12, %p2878_p11 }
  0x2c   :  { %p2881_p0 = pnand %p2880_p13, %p2874_p10 }
  0x2e   :  { %2884 = shalt.err (!%p2881_p0)
}
  0x2f   :  { %s3127_s22 = smov 16   ;;  %s3128_s27 = smov 1  }
  0x30   :  { %104 = dma.hbm_to_vmem [thread:$0]  %s3694_s7, 32, %s99_s23, [#allocation12], %s3127_s22, %s3127_s22, %s3128_s27  }
  0x31   :  { %s2893_s4 = scalar_lea.vmem %s123_s20, 32  ;;  %p2898_p2 = scmp.lt.s32.totalorder %s123_s20, %s123_s20 }
  0x32   :  { %p2894_p1 = scmp.ne.s32.totalorder %s123_s20, %s2893_s4  ;;  %p2899_p3 = scmp.lt.s32.totalorder %s2893_s4, %s2893_s4 }
  0x34   :  { %p2900_p4 = por %p2899_p3, %p2898_p2 }
  0x36   :  { %p2901_p5 = pnand %p2900_p4, %p2894_p1 }
  0x38   :  { %2904 = shalt.err (!%p2901_p5)
}
  0x39   :  { %128 = dma.hbm_to_vmem [thread:$0]  %s3696_s9, 32, %s123_s20, [#allocation15], %s3127_s22, %s3127_s22, %s3128_s27  }
  0x3a   :  { %s3129_s0 = smov [#allocation17]   ;;  %s3130_s1 = smov [#allocation20]  }
  0x3b   :  { %s150_s21 = sshll.u32 %s3129_s0, 4  ;;  %s174_s2 = sshll.u32 %s3130_s1, 4  ;;  %s151_s21 = int_to_ptr.vmem [resolvable:$true] %s150_s21  ;;  %s175_s2 = int_to_ptr.vmem [resolvable:$true] %s174_s2 }
  0x3c   :  { %s2913_s7 = scalar_lea.vmem %s151_s21, 32  ;;  %p2918_p7 = scmp.lt.s32.totalorder %s151_s21, %s151_s21 }
  0x3d   :  { %p2914_p6 = scmp.ne.s32.totalorder %s151_s21, %s2913_s7  ;;  %p2919_p8 = scmp.lt.s32.totalorder %s2913_s7, %s2913_s7 }
  0x3f   :  { %p2920_p9 = por %p2919_p8, %p2918_p7 }
  0x41   :  { %p2921_p10 = pnand %p2920_p9, %p2914_p6 }
  0x43   :  { %2924 = shalt.err (!%p2921_p10)
}
  0x44   :  { %156 = dma.hbm_to_vmem [thread:$0]  %s3700_s13, 32, %s151_s21, [#allocation18], %s3127_s22, %s3127_s22, %s3128_s27  }
  0x45   :  { %s2933_s9 = scalar_lea.vmem %s175_s2, 32  ;;  %p2938_p12 = scmp.lt.s32.totalorder %s175_s2, %s175_s2 }
  0x46   :  { %p2934_p11 = scmp.ne.s32.totalorder %s175_s2, %s2933_s9  ;;  %p2939_p13 = scmp.lt.s32.totalorder %s2933_s9, %s2933_s9 }
  0x48   :  { %p2940_p0 = por %p2939_p13, %p2938_p12 }
  0x4a   :  { %p2941_p1 = pnand %p2940_p0, %p2934_p11 }
  0x4c   :  { %2944 = shalt.err (!%p2941_p1)
}
  0x4d   :  { %180 = dma.hbm_to_vmem [thread:$0]  %s3702_s15, 32, %s175_s2, [#allocation21], %s3127_s22, %s3127_s22, %s3128_s27  }
  0x4e   :  { %s3131_s24 = smov [#allocation2]   ;;  %s3132_s29 = smov [#allocation7]  }
  0x4f   :  { %s38_s4 = sshll.u32 %s3131_s24, 4  ;;  %s63_s30 = sshll.u32 %s3132_s29, 4  ;;  %s39_s4 = int_to_ptr.vmem [resolvable:$true] %s38_s4  ;;  %s64_s30 = int_to_ptr.vmem [resolvable:$true] %s63_s30 }
  0x50   :  { %s2953_s13 = scalar_lea.vmem %s39_s4, 256  ;;  %p2958_p3 = scmp.lt.s32.totalorder %s39_s4, %s39_s4 }
  0x51   :  { %p2954_p2 = scmp.ne.s32.totalorder %s39_s4, %s2953_s13  ;;  %p2959_p4 = scmp.lt.s32.totalorder %s2953_s13, %s2953_s13 }
  0x53   :  { %p2960_p5 = por %p2959_p4, %p2958_p3 }
  0x55   :  { %p2961_p6 = pnand %p2960_p5, %p2954_p2 }
  0x57   :  { %2964 = shalt.err (!%p2961_p6)
}
  0x58   :  { %s3717_s1 = sld [smem:[#allocation32_spill]]  ;;  %s2973_s15 = scalar_lea.vmem %s64_s30, 16 }
  0x59   :  { %p2974_p7 = scmp.ne.s32.totalorder %s64_s30, %s2973_s15  ;;  %s2977_s2 = scalar_lea.vmem %s64_s30, 32 }
  0x5a   :  { %p2978_p8 = scmp.lt.s32.totalorder %s64_s30, %s64_s30  ;;  %p2979_p9 = scmp.lt.s32.totalorder %s2977_s2, %s2973_s15 }
  0x5c   :  { %p2980_p10 = por %p2979_p9, %p2978_p8 }
  0x5e   :  { %44 = dma.hbm_to_vmem [thread:$0]  %s3717_s1, 256, %s39_s4, [#allocation3], %s3123_s25, %s3123_s25, %s3124_s3  }
  0x5f   :  { %p2981_p11 = pnand %p2980_p10, %p2974_p7 }
  0x61   :  { %2984 = shalt.err (!%p2981_p11)
}
  0x62   :  { %s3718_s26 = sld [smem:[#allocation34_spill]]  ;;  %s3133_s9 = smov [#allocation10]  }
  0x63   :  { %s84_s20 = sshll.u32 %s3133_s9, 4  ;;  %s3134_s28 = smov [#allocation13]   ;;  %s85_s20 = int_to_ptr.vmem [resolvable:$true] %s84_s20 }
  0x64   :  { %s110_s24 = sshll.u32 %s3134_s28, 4  ;;  %s2993_s29 = scalar_lea.vmem %s85_s20, 32  ;;  %s111_s24 = int_to_ptr.vmem [resolvable:$true] %s110_s24 }
  0x65   :  { %p2994_p12 = scmp.ne.s32.totalorder %s85_s20, %s2993_s29  ;;  %p2998_p13 = scmp.lt.s32.totalorder %s85_s20, %s85_s20 }
  0x66   :  { %p2999_p0 = scmp.lt.s32.totalorder %s2993_s29, %s2993_s29 }
  0x68   :  { %66 = dma.hbm_to_vmem [thread:$0]  %s3718_s26, 16, %s64_s30, [#allocation6]  }
  0x69   :  { %p3000_p1 = por %p2999_p0, %p2998_p13 }
  0x6b   :  { %p3001_p2 = pnand %p3000_p1, %p2994_p12 }
  0x6d   :  { %3004 = shalt.err (!%p3001_p2)
}
  0x6e   :  { %90 = dma.hbm_to_vmem [thread:$0]  %s3692_s5, 32, %s85_s20, [#allocation9], %s3127_s22, %s3127_s22, %s3128_s27  }
  0x6f   :  { %s3013_s30 = scalar_lea.vmem %s111_s24, 32  ;;  %p3018_p4 = scmp.lt.s32.totalorder %s111_s24, %s111_s24 }
  0x70   :  { %p3014_p3 = scmp.ne.s32.totalorder %s111_s24, %s3013_s30  ;;  %p3019_p5 = scmp.lt.s32.totalorder %s3013_s30, %s3013_s30 }
  0x72   :  { %p3020_p6 = por %p3019_p5, %p3018_p4 }
  0x74   :  { %p3021_p7 = pnand %p3020_p6, %p3014_p3 }
  0x76   :  { %3024 = shalt.err (!%p3021_p7)
}
  0x77   :  { %116 = dma.hbm_to_vmem [thread:$0]  %s3695_s8, 32, %s111_s24, [#allocation12], %s3127_s22, %s3127_s22, %s3128_s27  }
  0x78   :  { %s3135_s21 = smov [#allocation16]   ;;  %s3136_s15 = smov [#allocation19]  }
  0x79   :  { %s136_s1 = sshll.u32 %s3135_s21, 4  ;;  %s162_s2 = sshll.u32 %s3136_s15, 4  ;;  %s137_s1 = int_to_ptr.vmem [resolvable:$true] %s136_s1  ;;  %s163_s2 = int_to_ptr.vmem [resolvable:$true] %s162_s2 }
  0x7a   :  { %s3033_s5 = scalar_lea.vmem %s137_s1, 32  ;;  %p3038_p9 = scmp.lt.s32.totalorder %s137_s1, %s137_s1 }
  0x7b   :  { %p3034_p8 = scmp.ne.s32.totalorder %s137_s1, %s3033_s5  ;;  %p3039_p10 = scmp.lt.s32.totalorder %s3033_s5, %s3033_s5 }
  0x7d   :  { %p3040_p11 = por %p3039_p10, %p3038_p9 }
  0x7f   :  { %p3041_p12 = pnand %p3040_p11, %p3034_p8 }
  0x81   :  { %3044 = shalt.err (!%p3041_p12)
}
  0x82   :  { %142 = dma.hbm_to_vmem [thread:$0]  %s3698_s11, 32, %s137_s1, [#allocation15], %s3127_s22, %s3127_s22, %s3128_s27  }
  0x83   :  { %s3053_s8 = scalar_lea.vmem %s163_s2, 32  ;;  %p3058_p0 = scmp.lt.s32.totalorder %s163_s2, %s163_s2 }
  0x84   :  { %p3054_p13 = scmp.ne.s32.totalorder %s163_s2, %s3053_s8  ;;  %p3059_p1 = scmp.lt.s32.totalorder %s3053_s8, %s3053_s8 }
  0x86   :  { %p3060_p2 = por %p3059_p1, %p3058_p0 }
  0x88   :  { %p3061_p3 = pnand %p3060_p2, %p3054_p13 }
  0x8a   :  { %3064 = shalt.err (!%p3061_p3)
}
  0x8b   :  { %168 = dma.hbm_to_vmem [thread:$0]  %s3701_s14, 32, %s163_s2, [#allocation18], %s3127_s22, %s3127_s22, %s3128_s27  }
  0x8c   :  { %s3137_s20 = smov [#allocation22]  }
  0x8d   :  { %s189_s28 = sshll.u32 %s3137_s20, 4  ;;  %s190_s28 = int_to_ptr.vmem [resolvable:$true] %s189_s28 }
  0x8e   :  { %s3073_s24 = scalar_lea.vmem %s190_s28, 16  ;;  %s3077_s11 = scalar_lea.vmem %s190_s28, 32 }
  0x8f   :  { %p3074_p4 = scmp.ne.s32.totalorder %s190_s28, %s3073_s24  ;;  %p3078_p5 = scmp.lt.s32.totalorder %s190_s28, %s190_s28 }
  0x90   :  { %p3079_p6 = scmp.lt.s32.totalorder %s3077_s11, %s3073_s24 }
  0x92   :  { %p3080_p7 = por %p3079_p6, %p3078_p5 }
  0x94   :  { %p3081_p8 = pnand %p3080_p7, %p3074_p4 }
  0x96   :  { %3084 = shalt.err (!%p3081_p8)
}
  0x97   :  { %192 = dma.hbm_to_vmem [thread:$0]  %s3704_s17, 16, %s190_s28, [#allocation21]  }
  0x98   :  { %3105 = dma.done.wait [#allocation3], 256  }
  0x99   :  { %3106 = vsyncadd [#allocation3], 4294967040 }
  0x9a   :  { %3107 = dma.done.wait [#allocation6], 272  }
  0x9b   :  { %3108 = vsyncadd [#allocation6], 4294967024 }
  0x9c   :  { %3109 = dma.done.wait [#allocation9], 48  }
  0x9d   :  { %3110 = vsyncadd [#allocation9], 4294967248 }
  0x9e   :  { %3111 = dma.done.wait [#allocation12], 64  }
  0x9f   :  { %3112 = vsyncadd [#allocation12], 4294967232 }
  0xa0   :  { %3113 = dma.done.wait [#allocation15], 64  }
  0xa1   :  { %3114 = vsyncadd [#allocation15], 4294967232 }
  0xa2   :  { %3115 = dma.done.wait [#allocation18], 64  }
  0xa3   :  { %3116 = vsyncadd [#allocation18], 4294967232 }
  0xa4   :  { %3117 = dma.done.wait [#allocation21], 48  }
  0xa5   :  { %3118 = vsyncadd [#allocation21], 4294967248  ;;  %vm243_vm0 = vcmask 261120   ;;  %v239_v0 = vld [vmem:[#allocation2] sm:$0xff]  ;;  %v240_v1 = vld [vmem:[#allocation2 + $0x8] sm:$0xff]  ;;  %s3719_s27 = sld [smem:[#allocation36_spill]] }
  0xa6   :  { %v244_v2 = vsel %vm243_vm0, %v239_v0, 0.0  ;;  %v247_v3 = vsel %vm243_vm0, %v240_v1, 0.0  ;;  %v3138_v15 = vmov 0.0   ;;  %vm3139_vm1 = vmmov 0   ;;  %v2305_v25 = vld [vmem:[#allocation7] ss:$0 sm:$0xff] }
  0xa7   :  { %245 = vadd.xlane.f32.xlu0 %v244_v2  ;;  %2461 = vmatprep.subr.bf16.mxu0 %v3138_v15  ;;  %v2306_v29 = vld [vmem:[#allocation8] ss:$0 sm:$0xff]  ;;  %v2307_v35 = vld [vmem:[#allocation10] ss:$0 sm:$0xff]  ;;  %s3140_s13 = smov 88   ;;  %s3141_s0 = smov 96  }
  0xa8   :  { %2465 = vmatprep.mubr.msk.bf16.mxu0 %vm3139_vm1, %v3138_v15  ;;  %2469 = vmatprep.subr.bf16.mxu1 %v3138_v15  ;;  %s3142_s21 = smov 80   ;;  %s3143_s1 = smov 72   ;;  %vm359_vm2 = vcmask 64512   ;;  %v3391_v53 = vld [vmem:[#allocation5] sm:$0xff]  ;;  %vm568_vm3 = vcmask 130048   ;;  %v3395_v60 = vld [vmem:[#allocation5 + $0x8] sm:$0xff] }
  0xa9   :  { %2471 = vmatprep.mubr.msk.bf16.mxu1 %vm3139_vm1, %v3138_v15  ;;  %s3144_s15 = smov 120   ;;  %s3145_s2 = smov 104   ;;  %vm877_vm4 = vcmask 195584   ;;  %vm1120_vm5 = vcmask 523264   ;;  %vm2146_vm6 = vcmask 1040384  }
  0xaa   :  { %s3146_s5 = smov 112   ;;  %s3147_s7 = smov 64  }
  0xab   :  { %248 = vadd.xlane.f32.xlu0 %v247_v3  ;;  %v2707_v14 = vld [vmem:[%s3719_s27 + $0x8] sm:$0xff]   ;;  %v2708_v16 = vld [vmem:[%s3719_s27] sm:$0xff]   ;;  %s3148_s23 = smov 48   ;;  %s3149_s8 = smov 40  }
  0xac   :  { %2462 = vmatpush3.bf16.msra.mxu0 %v2707_v14  ;;  %s3150_s26 = smov 56   ;;  %s3151_s11 = smov 24  }
  0xad   :  { %2463 = vmatprep.subr.bf16.mxu0 %v3138_v15  ;;  %s3152_s17 = smov [#allocation23]  }
  0xae   :  { %s2290_s4 = sshll.u32 %s3152_s17, 4  ;;  %s2291_s4 = int_to_ptr.vmem [resolvable:$true] %s2290_s4 }
  0xaf   :  { %p3090_p10 = scmp.lt.s32.totalorder %s2291_s4, %s2291_s4 }
  0xb0   :  { %2464 = vmatpush3.bf16.msra.mxu0 %v2708_v16 }
  0xb1   :  { %2475 = vmatprep.subr.bf16.mxu0 %v3138_v15 }
 0x130   :  { %v246_v4 = vpop.xlane.xlu0 %245 }
 0x131   :  { %v251_v5 = vmul.f32 0.03125, %v246_v4 }
 0x133   :  { %v253_v6 = vsub.f32 %v239_v0, %v251_v5 }
 0x134   :  { %v249_v7 = vpop.xlane.xlu0 %248 }
 0x135   :  { %v252_v8 = vmul.f32 0.03125, %v249_v7  ;;  %v255_v9 = vmul.f32 %v253_v6, %v253_v6 }
 0x137   :  { %v254_v10 = vsub.f32 %v240_v1, %v252_v8  ;;  %v257_v11 = vsel %vm243_vm0, %v255_v9, 0.0 }
 0x138   :  { %258 = vadd.xlane.f32.xlu1 %v257_v11 }
 0x139   :  { %v256_v12 = vmul.f32 %v254_v10, %v254_v10 }
 0x13b   :  { %v260_v13 = vsel %vm243_vm0, %v256_v12, 0.0 }
 0x13c   :  { %261 = vadd.xlane.f32.xlu1 %v260_v13 }
 0x1c1   :  { %v259_v17 = vpop.xlane.xlu1 %258 }
 0x1c2   :  { %v263_v18 = vmul.f32 0.03125, %v259_v17 }
 0x1c4   :  { %v265_v19 = vadd.f32 1e-12, %v263_v18 }
 0x1c5   :  { %v262_v20 = vpop.xlane.xlu1 %261 }
 0x1c6   :  { %2731 = vrsqrt.f32 %v265_v19  ;;  %v264_v21 = vmul.f32 0.03125, %v262_v20 }
 0x1c8   :  { %v266_v22 = vadd.f32 1e-12, %v264_v21 }
 0x1ca   :  { %2733 = vrsqrt.f32 %v266_v22 }
 0x1d3   :  { %v2732_v23 = vpop.eup %2731 }
 0x1d4   :  { %v269_v24 = vmul.f32 %v2732_v23, %v253_v6 }
 0x1d6   :  { %v277_v28 = vmul.f32 %v2305_v25, %v269_v24 }
 0x1d7   :  { %v2734_v26 = vpop.eup %2733 }
 0x1d8   :  { %v270_v27 = vmul.f32 %v2734_v26, %v254_v10  ;;  %v3345_v31 = vadd.f32 %v2306_v29, %v277_v28 }
 0x1da   :  { %v278_v30 = vmul.f32 %v2305_v25, %v270_v27 }
 0x1dc   :  { %v3347_v32 = vadd.f32 %v2306_v29, %v278_v30 }
 0x1de   :  { %v287_v33 = vpack.c.bf16 %v3347_v32, %v3345_v31 }
 0x1e0   :  { %2466 = vmatmul.mubr.msk.bf16.vlgmr.msra.gmra.mxu0 %vm243_vm0, %v287_v33 }
 0x1e1   :  { %2477 = vmatprep.mubr.msk.bf16.mxu0 %vm3139_vm1, %v3138_v15 }
 0x2a0   :  { %v348_v34 = vpop.f32.mrf.mxu0 }
 0x2a1   :  { %v349_v38 = vadd.f32 %v2307_v35, %v348_v34 }
 0x2a2   :  { %v2467_v36 = vpop.f32.mrf.mxu0 }
 0x2a4   :  { %v351_v37 = vpop.f32.mrf.mxu0 }
 0x2a5   :  { %v352_v39 = vadd.f32 %v2307_v35, %v351_v37 }
 0x2a6   :  { %v2468_v40 = vpop.f32.mrf.mxu0 }
 0x2a7   :  { %v3354_v41 = vpack.c.bf16 %v352_v39, %v349_v38 }
 0x2a9   :  { %409 = vrot.lane.b32.xlu1 %v3354_v41, %s3140_s13  ;;  %357 = vrot.lane.b32.xlu0 %v3354_v41, %s3141_s0 }
 0x2ad   :  { %460 = vrot.lane.b32.xlu1 %v3354_v41, %s3142_s21  ;;  %511 = vrot.lane.b32.xlu0 %v3354_v41, %s3143_s1 }
 0x2b1   :  { %407 = vrot.lane.b32.xlu1 %v3354_v41, %s3144_s15  ;;  %509 = vrot.lane.b32.xlu0 %v3354_v41, %s3145_s2 }
 0x2b5   :  { %458 = vrot.lane.b32.xlu1 %v3354_v41, %s3146_s5 }
 0x31b   :  { %v410_v42 = vpop.permute.xlu1 %409  ;;  %v358_v43 = vpop.permute.xlu0 %357 }
 0x31c   :  { %v415_v44 = vsel %vm359_vm2, %v410_v42, 0  ;;  %v364_v45 = vsel %vm359_vm2, %v358_v43, 0 }
 0x31d   :  { %2470 = vmatpush3.bf16.xpose.msra.mxu1 %v364_v45  ;;  %2476 = vmatpush3.bf16.xpose.msra.mxu0 %v415_v44 }
 0x31e   :  { %2481 = vmatprep.subr.bf16.mxu1 %v3138_v15  ;;  %2487 = vmatprep.subr.bf16.mxu0 %v3138_v15 }
 0x31f   :  { %v461_v46 = vpop.permute.xlu1 %460  ;;  %v512_v47 = vpop.permute.xlu0 %511 }
 0x320   :  { %v466_v49 = vsel %vm359_vm2, %v461_v46, 0  ;;  %v517_v50 = vsel %vm359_vm2, %v512_v47, 0 }
 0x323   :  { %v408_v48 = vpop.permute.xlu1 %407  ;;  %v510_v51 = vpop.permute.xlu0 %509 }
 0x324   :  { %2472 = vmatmul.mubr.msk.bf16.vlgmr.msra.gmra.mxu1 %vm359_vm2, %v3354_v41  ;;  %2478 = vmatmul.mubr.msk.bf16.vlgmr.msra.gmra.mxu0 %vm359_vm2, %v408_v48 }
 0x325   :  { %2482 = vmatpush3.bf16.xpose.msra.mxu1 %v466_v49  ;;  %2488 = vmatpush3.bf16.xpose.msra.mxu0 %v517_v50 }
 0x326   :  { %2483 = vmatprep.mubr.msk.bf16.mxu1 %vm3139_vm1, %v3138_v15  ;;  %2489 = vmatprep.mubr.msk.bf16.mxu0 %vm3139_vm1, %v3138_v15 }
 0x327   :  { %2493 = vmatprep.subr.bf16.mxu1 %v3138_v15  ;;  %2499 = vmatprep.subr.bf16.mxu0 %v3138_v15  ;;  %v459_v52 = vpop.permute.xlu1 %458 }
 0x32c   :  { %2484 = vmatmul.mubr.msk.bf16.vlgmr.msra.gmra.mxu1 %vm359_vm2, %v459_v52  ;;  %2490 = vmatmul.mubr.msk.bf16.vlgmr.msra.gmra.mxu0 %vm359_vm2, %v510_v51 }
 0x32d   :  { %2495 = vmatprep.mubr.msk.bf16.mxu1 %vm3139_vm1, %v3138_v15  ;;  %2501 = vmatprep.mubr.msk.bf16.mxu0 %vm3139_vm1, %v3138_v15 }
 0x3e4   :  { %v400_v54 = vpop.f32.mrf.mxu1  ;;  %v451_v55 = vpop.f32.mrf.mxu0 }
 0x3e5   :  { %v560_v56 = vadd.f32 %v400_v54, %v3391_v53  ;;  %v562_v57 = vadd.f32 %v451_v55, %v3391_v53 }
 0x3e6   :  { %v2473_v58 = vpop.f32.mrf.mxu1  ;;  %v2479_v59 = vpop.f32.mrf.mxu0 }
 0x3e7   :  { %v575_v61 = vsel %vm568_vm3, %v562_v57, -inf  ;;  %v569_v62 = vsel %vm568_vm3, %v560_v56, -inf }
 0x3e8   :  { %v403_v63 = vpop.f32.mrf.mxu1  ;;  %v454_v0 = vpop.f32.mrf.mxu0  ;;  %576 = vmax.xlane.f32.xlu0 %v575_v61  ;;  %570 = vmax.xlane.f32.xlu1 %v569_v62 }
 0x3e9   :  { %v561_v1 = vadd.f32 %v403_v63, %v3395_v60  ;;  %v563_v4 = vadd.f32 %v454_v0, %v3395_v60 }
 0x3ea   :  { %v2474_v2 = vpop.f32.mrf.mxu1  ;;  %v2480_v3 = vpop.f32.mrf.mxu0 }
 0x3eb   :  { %v572_v5 = vsel %vm568_vm3, %v561_v1, -inf  ;;  %v578_v12 = vsel %vm568_vm3, %v563_v4, -inf }
 0x3ec   :  { %v502_v6 = vpop.f32.mrf.mxu1  ;;  %v553_v7 = vpop.f32.mrf.mxu0  ;;  %573 = vmax.xlane.f32.xlu0 %v572_v5 }
 0x3ed   :  { %v564_v8 = vadd.f32 %v502_v6, %v3391_v53  ;;  %v566_v11 = vadd.f32 %v553_v7, %v3391_v53 }
 0x3ee   :  { %v2485_v9 = vpop.f32.mrf.mxu1  ;;  %v2491_v10 = vpop.f32.mrf.mxu0 }
 0x3ef   :  { %v581_v13 = vsel %vm568_vm3, %v564_v8, -inf  ;;  %v587_v22 = vsel %vm568_vm3, %v566_v11, -inf }
 0x3f0   :  { %v505_v14 = vpop.f32.mrf.mxu1  ;;  %v556_v16 = vpop.f32.mrf.mxu0  ;;  %579 = vmax.xlane.f32.xlu0 %v578_v12  ;;  %582 = vmax.xlane.f32.xlu1 %v581_v13 }
 0x3f1   :  { %v565_v17 = vadd.f32 %v505_v14, %v3395_v60  ;;  %v567_v20 = vadd.f32 %v556_v16, %v3395_v60 }
 0x3f2   :  { %v2486_v18 = vpop.f32.mrf.mxu1  ;;  %v2492_v19 = vpop.f32.mrf.mxu0 }
 0x3f3   :  { %v584_v21 = vsel %vm568_vm3, %v565_v17, -inf  ;;  %v590_v23 = vsel %vm568_vm3, %v567_v20, -inf }
 0x3f4   :  { %585 = vmax.xlane.f32.xlu0 %v584_v21  ;;  %588 = vmax.xlane.f32.xlu1 %v587_v22 }
 0x3f8   :  { %591 = vmax.xlane.f32.xlu0 %v590_v23 }
 0x405   :  { %661 = vrot.lane.b32.xlu1 %v3354_v41, %s3147_s7 }
 0x471   :  { %v577_v24 = vpop.xlane.xlu0 %576  ;;  %v571_v25 = vpop.xlane.xlu1 %570 }
 0x472   :  { %v595_v26 = vsub.f32 %v562_v57, %v577_v24  ;;  %v593_v27 = vsub.f32 %v560_v56, %v571_v25 }
 0x474   :  { %v601_v28 = vmul.f32 1.442695, %v593_v27  ;;  %v605_v29 = vmul.f32 1.442695, %v595_v26 }
 0x475   :  { %v574_v30 = vpop.xlane.xlu0 %573 }
 0x476   :  { %v594_v33 = vsub.f32 %v561_v1, %v574_v30  ;;  %2735 = vpow2.f32 %v601_v28 }
 0x477   :  { %2737 = vpow2.f32 %v605_v29 }
 0x478   :  { %v603_v34 = vmul.f32 1.442695, %v594_v33 }
 0x479   :  { %v580_v35 = vpop.xlane.xlu0 %579  ;;  %v583_v36 = vpop.xlane.xlu1 %582 }
 0x47a   :  { %2739 = vpow2.f32 %v603_v34  ;;  %v596_v37 = vsub.f32 %v563_v4, %v580_v35  ;;  %v597_v38 = vsub.f32 %v564_v8, %v583_v36 }
 0x47c   :  { %v607_v39 = vmul.f32 1.442695, %v596_v37  ;;  %v609_v40 = vmul.f32 1.442695, %v597_v38 }
 0x47d   :  { %v586_v42 = vpop.xlane.xlu0 %585  ;;  %v589_v43 = vpop.xlane.xlu1 %588 }
 0x47e   :  { %2741 = vpow2.f32 %v607_v39  ;;  %v598_v44 = vsub.f32 %v565_v17, %v586_v42  ;;  %v599_v45 = vsub.f32 %v566_v11, %v589_v43  ;;  %v2709_v42 = vld [vmem:[%s3693_s6 + $0x8] sm:$0xff]  }
 0x47f   :  { %2743 = vpow2.f32 %v609_v40 }
 0x480   :  { %v611_v46 = vmul.f32 1.442695, %v598_v44  ;;  %v613_v47 = vmul.f32 1.442695, %v599_v45 }
 0x481   :  { %v592_v48 = vpop.xlane.xlu0 %591  ;;  %v662_v49 = vpop.permute.xlu1 %661 }
 0x482   :  { %2745 = vpow2.f32 %v611_v46  ;;  %v600_v50 = vsub.f32 %v567_v20, %v592_v48  ;;  %2494 = vmatpush3.bf16.msra.mxu1 %v662_v49 }
 0x483   :  { %2747 = vpow2.f32 %v613_v47  ;;  %2505 = vmatprep.subr.bf16.mxu1 %v3138_v15  ;;  %v2736_v51 = vpop.eup %2735  ;;  %v2710_v47 = vld [vmem:[%s3693_s6] sm:$0xff]  }
 0x484   :  { %v615_v52 = vmul.f32 1.442695, %v600_v50  ;;  %v617_v54 = vsel %vm568_vm3, %v2736_v51, 0.0  ;;  %v2738_v55 = vpop.eup %2737 }
 0x485   :  { %618 = vadd.xlane.f32.xlu1 %v617_v54  ;;  %v623_v58 = vsel %vm568_vm3, %v2738_v55, 0.0 }
 0x486   :  { %2749 = vpow2.f32 %v615_v52 }
 0x487   :  { %v2740_v56 = vpop.eup %2739 }
 0x488   :  { %v620_v57 = vsel %vm568_vm3, %v2740_v56, 0.0 }
 0x489   :  { %621 = vadd.xlane.f32.xlu0 %v620_v57  ;;  %624 = vadd.xlane.f32.xlu1 %v623_v58 }
 0x48b   :  { %v2742_v59 = vpop.eup %2741 }
 0x48c   :  { %v2744_v61 = vpop.eup %2743  ;;  %v626_v62 = vsel %vm568_vm3, %v2742_v59, 0.0 }
 0x48d   :  { %627 = vadd.xlane.f32.xlu0 %v626_v62  ;;  %v629_v63 = vsel %vm568_vm3, %v2744_v61, 0.0 }
 0x48e   :  { %630 = vadd.xlane.f32.xlu1 %v629_v63 }
 0x48f   :  { %v2746_v0 = vpop.eup %2745 }
 0x490   :  { %v2748_v1 = vpop.eup %2747  ;;  %v632_v2 = vsel %vm568_vm3, %v2746_v0, 0.0 }
 0x491   :  { %633 = vadd.xlane.f32.xlu0 %v632_v2  ;;  %v635_v3 = vsel %vm568_vm3, %v2748_v1, 0.0 }
 0x492   :  { %636 = vadd.xlane.f32.xlu1 %v635_v3 }
 0x493   :  { %v2750_v4 = vpop.eup %2749 }
 0x494   :  { %v638_v5 = vsel %vm568_vm3, %v2750_v4, 0.0 }
 0x495   :  { %639 = vadd.xlane.f32.xlu0 %v638_v5 }
 0x4a3   :  { %755 = vrot.lane.b32.xlu1 %v3354_v41, %s3148_s23 }
 0x4a7   :  { %802 = vrot.lane.b32.xlu1 %v3354_v41, %s3149_s8 }
 0x4ab   :  { %708 = vrot.lane.b32.xlu0 %v3354_v41, %s3150_s26 }
 0x50e   :  { %v619_v6 = vpop.xlane.xlu1 %618 }
 0x50f   :  { %2751 = vrcp.f32 %v619_v6 }
 0x512   :  { %v622_v7 = vpop.xlane.xlu0 %621  ;;  %v625_v8 = vpop.xlane.xlu1 %624 }
 0x513   :  { %2753 = vrcp.f32 %v622_v7 }
 0x514   :  { %2755 = vrcp.f32 %v625_v8 }
 0x516   :  { %v628_v9 = vpop.xlane.xlu0 %627 }
 0x517   :  { %2757 = vrcp.f32 %v628_v9  ;;  %v631_v10 = vpop.xlane.xlu1 %630 }
 0x518   :  { %2759 = vrcp.f32 %v631_v10 }
 0x51a   :  { %v634_v11 = vpop.xlane.xlu0 %633 }
 0x51b   :  { %2761 = vrcp.f32 %v634_v11  ;;  %v637_v12 = vpop.xlane.xlu1 %636 }
 0x51c   :  { %2763 = vrcp.f32 %v637_v12  ;;  %v2752_v13 = vpop.eup %2751 }
 0x51d   :  { %v649_v17 = vmul.f32 %v2752_v13, %v2736_v51 }
 0x51e   :  { %v640_v14 = vpop.xlane.xlu0 %639 }
 0x51f   :  { %2765 = vrcp.f32 %v640_v14  ;;  %v756_v20 = vpop.permute.xlu1 %755 }
 0x520   :  { %v2754_v16 = vpop.eup %2753 }
 0x521   :  { %v650_v41 = vmul.f32 %v2754_v16, %v2740_v56  ;;  %v2756_v18 = vpop.eup %2755  ;;  %v2319_v16 = vld [vmem:[#allocation11] ss:$0 sm:$0xff] }
 0x522   :  { %v709_v19 = vpop.permute.xlu0 %708  ;;  %v651_v23 = vmul.f32 %v2756_v18, %v2738_v55 }
 0x523   :  { %2500 = vmatpush3.bf16.msra.mxu0 %v709_v19  ;;  %v657_v21 = vpack.c.bf16 %v650_v41, %v649_v17  ;;  %v803_v28 = vpop.permute.xlu1 %802 }
 0x524   :  { %v2758_v22 = vpop.eup %2757  ;;  %2511 = vmatprep.subr.bf16.mxu0 %v3138_v15 }
 0x525   :  { %2496 = vmatmul.mubr.msk.bf16.vlgmr.msra.gmra.mxu1 %vm568_vm3, %v657_v21  ;;  %v652_v24 = vmul.f32 %v2758_v22, %v2742_v59  ;;  %v2760_v25 = vpop.eup %2759 }
 0x526   :  { %2506 = vmatpush3.bf16.msra.mxu1 %v756_v20  ;;  %2507 = vmatprep.mubr.msk.bf16.mxu1 %vm3139_vm1, %v3138_v15  ;;  %v653_v29 = vmul.f32 %v2760_v25, %v2744_v61 }
 0x527   :  { %v658_v26 = vpack.c.bf16 %v652_v24, %v651_v23  ;;  %2517 = vmatprep.subr.bf16.mxu1 %v3138_v15 }
 0x528   :  { %v2762_v27 = vpop.eup %2761 }
 0x529   :  { %2502 = vmatmul.mubr.msk.bf16.vlgmr.msra.gmra.mxu0 %vm568_vm3, %v658_v26  ;;  %v654_v30 = vmul.f32 %v2762_v27, %v2746_v0  ;;  %v2764_v33 = vpop.eup %2763 }
 0x52a   :  { %2512 = vmatpush3.bf16.msra.mxu0 %v803_v28  ;;  %2513 = vmatprep.mubr.msk.bf16.mxu0 %vm3139_vm1, %v3138_v15  ;;  %v655_v36 = vmul.f32 %v2764_v33, %v2748_v1 }
 0x52b   :  { %v659_v34 = vpack.c.bf16 %v654_v30, %v653_v29  ;;  %2525 = vmatprep.subr.bf16.mxu0 %v3138_v15 }
 0x52c   :  { %v2766_v35 = vpop.eup %2765 }
 0x52d   :  { %2508 = vmatmul.mubr.msk.bf16.vlgmr.msra.gmra.mxu1 %vm568_vm3, %v659_v34  ;;  %v656_v37 = vmul.f32 %v2766_v35, %v2750_v4 }
 0x52e   :  { %2521 = vmatprep.mubr.msk.bf16.mxu1 %vm3139_vm1, %v3138_v15  ;;  %2518 = vmatpush3.bf16.msra.mxu1 %v2709_v42 }
 0x52f   :  { %v660_v38 = vpack.c.bf16 %v656_v37, %v655_v36  ;;  %2519 = vmatprep.subr.bf16.mxu1 %v3138_v15  ;;  %v2712_v37 = vld [vmem:[%s3697_s10] sm:$0xff]  }
 0x531   :  { %2514 = vmatmul.mubr.msk.bf16.vlgmr.msra.gmra.mxu0 %vm568_vm3, %v660_v38 }
 0x532   :  { %2529 = vmatprep.mubr.msk.bf16.mxu0 %vm3139_vm1, %v3138_v15  ;;  %2520 = vmatpush3.bf16.msra.mxu1 %v2710_v47  ;;  %v2323_v47 = vld [vmem:[#allocation13] ss:$0 sm:$0xff] }
 0x533   :  { %2533 = vmatprep.subr.bf16.mxu1 %v3138_v15 }
 0x5e5   :  { %v701_v39 = vpop.f32.mrf.mxu1 }
 0x5e7   :  { %v2497_v40 = vpop.f32.mrf.mxu1 }
 0x5e9   :  { %v704_v43 = vpop.f32.mrf.mxu1  ;;  %v748_v44 = vpop.f32.mrf.mxu0 }
 0x5eb   :  { %v2498_v45 = vpop.f32.mrf.mxu1  ;;  %v2503_v46 = vpop.f32.mrf.mxu0 }
 0x5ed   :  { %v751_v48 = vpop.f32.mrf.mxu0  ;;  %v795_v49 = vpop.f32.mrf.mxu1 }
 0x5ee   :  { %v2677_v50 = vpack.i.bf16 %v751_v48, %v748_v44 }
 0x5ef   :  { %v2504_v51 = vpop.f32.mrf.mxu0  ;;  %v2509_v52 = vpop.f32.mrf.mxu1 }
 0x5f0   :  { %2678 = vrot.lane.b32.xlu1 %v2677_v50, %s3124_s3  ;;  %v2324_v51 = vld [vmem:[#allocation14] ss:$0 sm:$0xff] }
 0x5f1   :  { %v798_v54 = vpop.f32.mrf.mxu1  ;;  %v842_v55 = vpop.f32.mrf.mxu0 }
 0x5f2   :  { %v2682_v56 = vpack.i.bf16 %v798_v54, %v795_v49 }
 0x5f3   :  { %v2510_v57 = vpop.f32.mrf.mxu1  ;;  %v2515_v58 = vpop.f32.mrf.mxu0 }
 0x5f4   :  { %2683 = vrot.lane.b32.xlu0 %v2682_v56, %s3127_s22  ;;  %v2713_v57 = vld [vmem:[%s3699_s12 + $0x18] sm:$0xff]   ;;  %v2714_v58 = vld [vmem:[%s3699_s12 + $0x10] sm:$0xff]  }
 0x5f5   :  { %v845_v59 = vpop.f32.mrf.mxu0 }
 0x5f6   :  { %v2687_v61 = vpack.i.bf16 %v845_v59, %v842_v55  ;;  %v2715_v59 = vld [vmem:[%s3699_s12 + $0x8] sm:$0xff]  }
 0x5f7   :  { %v2516_v62 = vpop.f32.mrf.mxu0 }
 0x5f8   :  { %2688 = vrot.lane.b32.xlu1 %v2687_v61, %s3151_s11  ;;  %v2716_v61 = vld [vmem:[%s3699_s12] sm:$0xff]   ;;  %v2325_v62 = vld [vmem:[#allocation16] ss:$0 sm:$0xff] }
 0x662   :  { %v2679_v63 = vpop.permute.xlu1 %2678 }
 0x663   :  { %v2681_v1 = vunpack.i.h.bf16 %v2679_v63  ;;  %v2680_v2 = vunpack.i.l.bf16 %v2679_v63 }
 0x665   :  { %v874_v6 = vsel %vm359_vm2, %v704_v43, %v2681_v1  ;;  %v873_v7 = vsel %vm359_vm2, %v701_v39, %v2680_v2 }
 0x666   :  { %v2684_v0 = vpop.permute.xlu0 %2683 }
 0x667   :  { %v2686_v3 = vunpack.i.h.bf16 %v2684_v0  ;;  %v2685_v4 = vunpack.i.l.bf16 %v2684_v0 }
 0x669   :  { %v875_v10 = vsel %vm568_vm3, %v873_v7, %v2685_v4  ;;  %v876_v11 = vsel %vm568_vm3, %v874_v6, %v2686_v3 }
 0x66a   :  { %v2689_v5 = vpop.permute.xlu1 %2688 }
 0x66b   :  { %v2691_v8 = vunpack.i.h.bf16 %v2689_v5  ;;  %v2690_v9 = vunpack.i.l.bf16 %v2689_v5 }
 0x66d   :  { %v878_v12 = vsel %vm877_vm4, %v875_v10, %v2690_v9  ;;  %v879_v13 = vsel %vm877_vm4, %v876_v11, %v2691_v8 }
 0x66e   :  { %v880_v14 = vpack.c.bf16 %v879_v13, %v878_v12 }
 0x670   :  { %2522 = vmatmul.mubr.msk.bf16.vlgmr.msra.gmra.mxu1 %vm243_vm0, %v880_v14 }
 0x671   :  { %2541 = vmatprep.mubr.msk.bf16.mxu1 %vm3139_vm1, %v3138_v15  ;;  %2534 = vmatpush3.bf16.msra.mxu1 %v2713_v57  ;;  %v2335_v57 = vld [vmem:[#allocation19] ss:$0 sm:$0xff] }
 0x672   :  { %2535 = vmatprep.subr.bf16.mxu1 %v3138_v15 }
 0x675   :  { %2536 = vmatpush3.bf16.msra.mxu1 %v2714_v58 }
 0x676   :  { %2537 = vmatprep.subr.bf16.mxu1 %v3138_v15 }
 0x679   :  { %2538 = vmatpush3.bf16.msra.mxu1 %v2715_v59 }
 0x67a   :  { %2539 = vmatprep.subr.bf16.mxu1 %v3138_v15 }
 0x67d   :  { %2540 = vmatpush3.bf16.msra.mxu1 %v2716_v61 }
 0x67e   :  { %2559 = vmatprep.subr.bf16.mxu1 %v3138_v15 }
 0x730   :  { %v941_v17 = vpop.f32.mrf.mxu1 }
 0x731   :  { %v942_v41 = vadd.f32 %v2319_v16, %v941_v17 }
 0x732   :  { %v2523_v18 = vpop.f32.mrf.mxu1 }
 0x733   :  { %v948_v19 = vadd.f32 %v942_v41, %v3345_v31 }
 0x734   :  { %v944_v20 = vpop.f32.mrf.mxu1 }
 0x735   :  { %v945_v21 = vadd.f32 %v2319_v16, %v944_v20  ;;  %v952_v22 = vsel %vm243_vm0, %v948_v19, 0.0 }
 0x736   :  { %953 = vadd.xlane.f32.xlu0 %v952_v22  ;;  %v2524_v23 = vpop.f32.mrf.mxu1 }
 0x737   :  { %v949_v24 = vadd.f32 %v945_v21, %v3347_v32  ;;  %v2711_v32 = vld [vmem:[%s3697_s10 + $0x8] sm:$0xff]  }
 0x738   :  { %2526 = vmatpush3.bf16.msra.mxu0 %v2711_v32 }
 0x739   :  { %v955_v25 = vsel %vm243_vm0, %v949_v24, 0.0  ;;  %2527 = vmatprep.subr.bf16.mxu0 %v3138_v15 }
 0x73a   :  { %956 = vadd.xlane.f32.xlu1 %v955_v25 }
 0x73c   :  { %2528 = vmatpush3.bf16.msra.mxu0 %v2712_v37 }
 0x73d   :  { %2545 = vmatprep.subr.bf16.mxu0 %v3138_v15 }
 0x7bf   :  { %v954_v26 = vpop.xlane.xlu0 %953 }
 0x7c0   :  { %v958_v27 = vmul.f32 0.03125, %v954_v26 }
 0x7c2   :  { %v960_v28 = vsub.f32 %v948_v19, %v958_v27 }
 0x7c3   :  { %v957_v29 = vpop.xlane.xlu1 %956 }
 0x7c4   :  { %v959_v30 = vmul.f32 0.03125, %v957_v29  ;;  %v962_v33 = vmul.f32 %v960_v28, %v960_v28 }
 0x7c6   :  { %v961_v34 = vsub.f32 %v949_v24, %v959_v30  ;;  %v964_v31 = vsel %vm243_vm0, %v962_v33, 0.0  ;;  %v2329_v24 = vld [vmem:[#allocation17] ss:$0 sm:$0xff] }
 0x7c7   :  { %965 = vadd.xlane.f32.xlu0 %v964_v31 }
 0x7c8   :  { %v963_v35 = vmul.f32 %v961_v34, %v961_v34 }
 0x7ca   :  { %v967_v36 = vsel %vm243_vm0, %v963_v35, 0.0 }
 0x7cb   :  { %968 = vadd.xlane.f32.xlu0 %v967_v36 }
 0x850   :  { %v966_v38 = vpop.xlane.xlu0 %965 }
 0x851   :  { %v970_v39 = vmul.f32 0.03125, %v966_v38 }
 0x853   :  { %v972_v40 = vadd.f32 1e-12, %v970_v39 }
 0x854   :  { %v969_v42 = vpop.xlane.xlu0 %968 }
 0x855   :  { %2767 = vrsqrt.f32 %v972_v40  ;;  %v971_v43 = vmul.f32 0.03125, %v969_v42 }
 0x857   :  { %v973_v44 = vadd.f32 1e-12, %v971_v43 }
 0x859   :  { %2769 = vrsqrt.f32 %v973_v44 }
 0x862   :  { %v2768_v45 = vpop.eup %2767 }
 0x863   :  { %v976_v46 = vmul.f32 %v2768_v45, %v960_v28 }
 0x865   :  { %v984_v50 = vmul.f32 %v2323_v47, %v976_v46  ;;  %v2717_v46 = vld [vmem:[%s3719_s27 + $0x18] sm:$0xff]  }
 0x866   :  { %v2770_v48 = vpop.eup %2769 }
 0x867   :  { %v977_v49 = vmul.f32 %v2770_v48, %v961_v34  ;;  %v992_v54 = vadd.f32 %v2324_v51, %v984_v50 }
 0x869   :  { %v985_v52 = vmul.f32 %v2323_v47, %v977_v49  ;;  %v2718_v47 = vld [vmem:[%s3719_s27 + $0x10] sm:$0xff]  }
 0x86b   :  { %v993_v55 = vadd.f32 %v2324_v51, %v985_v52 }
 0x86d   :  { %v994_v56 = vpack.c.bf16 %v993_v55, %v992_v54 }
 0x86f   :  { %2530 = vmatmul.mubr.msk.bf16.vlgmr.msra.gmra.mxu0 %vm243_vm0, %v994_v56 }
 0x870   :  { %2549 = vmatprep.mubr.msk.bf16.mxu0 %vm3139_vm1, %v3138_v15  ;;  %2546 = vmatpush3.bf16.msra.mxu0 %v2717_v46 }
 0x871   :  { %2547 = vmatprep.subr.bf16.mxu0 %v3138_v15 }
 0x874   :  { %2548 = vmatpush3.bf16.msra.mxu0 %v2718_v47 }
 0x875   :  { %2553 = vmatprep.subr.bf16.mxu0 %v3138_v15 }
 0x92f   :  { %v1055_v63 = vpop.f32.mrf.mxu0 }
 0x930   :  { %v1056_v0 = vadd.f32 %v2325_v62, %v1055_v63 }
 0x931   :  { %v2531_v1 = vpop.f32.mrf.mxu0 }
 0x932   :  { %v1062_v2 = vmul.f32 %v1056_v0, %v1056_v0 }
 0x933   :  { %v1058_v3 = vpop.f32.mrf.mxu0 }
 0x934   :  { %v1064_v4 = vmul.f32 %v1062_v2, %v1056_v0  ;;  %v1059_v5 = vadd.f32 %v2325_v62, %v1058_v3  ;;  %v2336_v62 = vld [vmem:[#allocation20] ss:$0 sm:$0xff] }
 0x935   :  { %v2532_v6 = vpop.f32.mrf.mxu0 }
 0x936   :  { %v1066_v7 = vmul.f32 0.044715, %v1064_v4  ;;  %v1063_v8 = vmul.f32 %v1059_v5, %v1059_v5  ;;  %v2341_v4 = vld [vmem:[#allocation10 + $0x1] ss:$0 sm:$0xff] }
 0x938   :  { %v1068_v9 = vadd.f32 %v1066_v7, %v1056_v0  ;;  %v1065_v10 = vmul.f32 %v1063_v8, %v1059_v5 }
 0x93a   :  { %v1070_v11 = vmul.f32 0.7978846, %v1068_v9  ;;  %v1067_v12 = vmul.f32 0.044715, %v1065_v10 }
 0x93c   :  { %2771 = vtanh.f32 %v1070_v11  ;;  %v1069_v13 = vadd.f32 %v1067_v12, %v1059_v5 }
 0x93e   :  { %v1071_v14 = vmul.f32 0.7978846, %v1069_v13 }
 0x940   :  { %2773 = vtanh.f32 %v1071_v14 }
 0x949   :  { %v2772_v16 = vpop.eup %2771 }
 0x94a   :  { %v1074_v17 = vadd.f32 1.0, %v2772_v16 }
 0x94c   :  { %v1076_v18 = vmul.f32 0.5, %v1074_v17 }
 0x94d   :  { %v2774_v41 = vpop.eup %2773 }
 0x94e   :  { %v1075_v19 = vadd.f32 1.0, %v2774_v41  ;;  %v1078_v21 = vmul.f32 %v1076_v18, %v1056_v0 }
 0x950   :  { %v1077_v20 = vmul.f32 0.5, %v1075_v19 }
 0x952   :  { %v1079_v22 = vmul.f32 %v1077_v20, %v1059_v5 }
 0x954   :  { %v1080_v23 = vpack.c.bf16 %v1079_v22, %v1078_v21 }
 0x956   :  { %2542 = vmatmul.mubr.msk.bf16.vlgmr.msra.gmra.mxu1 %vm1120_vm5, %v1080_v23 }
 0x957   :  { %2561 = vmatprep.mubr.msk.bf16.mxu1 %vm3139_vm1, %v3138_v15 }
 0xa16   :  { %v1158_v25 = vpop.f32.mrf.mxu1 }
 0xa17   :  { %v1159_v26 = vadd.f32 %v2329_v24, %v1158_v25 }
 0xa18   :  { %v2543_v27 = vpop.f32.mrf.mxu1 }
 0xa19   :  { %v1165_v28 = vadd.f32 %v1159_v26, %v992_v54 }
 0xa1a   :  { %v1161_v29 = vpop.f32.mrf.mxu1 }
 0xa1b   :  { %v1162_v30 = vadd.f32 %v2329_v24, %v1161_v29  ;;  %v1169_v33 = vsel %vm243_vm0, %v1165_v28, 0.0 }
 0xa1c   :  { %1170 = vadd.xlane.f32.xlu0 %v1169_v33  ;;  %v2544_v34 = vpop.f32.mrf.mxu1 }
 0xa1d   :  { %v1166_v31 = vadd.f32 %v1162_v30, %v993_v55 }
 0xa1f   :  { %v1172_v35 = vsel %vm243_vm0, %v1166_v31, 0.0 }
 0xa20   :  { %1173 = vadd.xlane.f32.xlu1 %v1172_v35 }
 0xaa5   :  { %v1171_v36 = vpop.xlane.xlu0 %1170 }
 0xaa6   :  { %v1175_v32 = vmul.f32 0.03125, %v1171_v36 }
 0xaa8   :  { %v1177_v37 = vsub.f32 %v1165_v28, %v1175_v32 }
 0xaa9   :  { %v1174_v38 = vpop.xlane.xlu1 %1173 }
 0xaaa   :  { %v1176_v39 = vmul.f32 0.03125, %v1174_v38  ;;  %v1179_v40 = vmul.f32 %v1177_v37, %v1177_v37 }
 0xaac   :  { %v1178_v42 = vsub.f32 %v1166_v31, %v1176_v39  ;;  %v1181_v43 = vsel %vm243_vm0, %v1179_v40, 0.0 }
 0xaad   :  { %1182 = vadd.xlane.f32.xlu0 %v1181_v43 }
 0xaae   :  { %v1180_v44 = vmul.f32 %v1178_v42, %v1178_v42 }
 0xab0   :  { %v1184_v45 = vsel %vm243_vm0, %v1180_v44, 0.0 }
 0xab1   :  { %1185 = vadd.xlane.f32.xlu1 %v1184_v45 }
 0xb36   :  { %v1183_v48 = vpop.xlane.xlu0 %1182 }
 0xb37   :  { %v1187_v49 = vmul.f32 0.03125, %v1183_v48 }
 0xb39   :  { %v1189_v50 = vadd.f32 1e-12, %v1187_v49 }
 0xb3a   :  { %v1186_v51 = vpop.xlane.xlu1 %1185 }
 0xb3b   :  { %2775 = vrsqrt.f32 %v1189_v50  ;;  %v1188_v52 = vmul.f32 0.03125, %v1186_v51 }
 0xb3d   :  { %v1190_v54 = vadd.f32 1e-12, %v1188_v52 }
 0xb3f   :  { %2777 = vrsqrt.f32 %v1190_v54 }
 0xb48   :  { %v2776_v55 = vpop.eup %2775 }
 0xb49   :  { %v1193_v56 = vmul.f32 %v2776_v55, %v1177_v37 }
 0xb4b   :  { %v1201_v61 = vmul.f32 %v2335_v57, %v1193_v56 }
 0xb4c   :  { %v2778_v58 = vpop.eup %2777 }
 0xb4d   :  { %v1194_v59 = vmul.f32 %v2778_v58, %v1178_v42  ;;  %v3511_v0 = vadd.f32 %v2336_v62, %v1201_v61 }
 0xb4f   :  { %v1202_v63 = vmul.f32 %v2335_v57, %v1194_v59 }
 0xb51   :  { %v3513_v1 = vadd.f32 %v2336_v62, %v1202_v63 }
 0xb53   :  { %v1211_v2 = vpack.c.bf16 %v3513_v1, %v3511_v0 }
 0xb55   :  { %2550 = vmatmul.mubr.msk.bf16.vlgmr.msra.gmra.mxu0 %vm243_vm0, %v1211_v2 }
 0xb56   :  { %2555 = vmatprep.mubr.msk.bf16.mxu0 %vm3139_vm1, %v3138_v15 }
 0xc15   :  { %v1274_v3 = vpop.f32.mrf.mxu0 }
 0xc16   :  { %v1275_v7 = vadd.f32 %v2341_v4, %v1274_v3 }
 0xc17   :  { %v2551_v5 = vpop.f32.mrf.mxu0 }
 0xc19   :  { %v1277_v6 = vpop.f32.mrf.mxu0 }
 0xc1a   :  { %v1278_v8 = vadd.f32 %v2341_v4, %v1277_v6 }
 0xc1b   :  { %v2552_v9 = vpop.f32.mrf.mxu0 }
 0xc1c   :  { %v3520_v10 = vpack.c.bf16 %v1278_v8, %v1275_v7 }
 0xc1e   :  { %1334 = vrot.lane.b32.xlu1 %v3520_v10, %s3140_s13  ;;  %1283 = vrot.lane.b32.xlu0 %v3520_v10, %s3141_s0 }
 0xc22   :  { %1385 = vrot.lane.b32.xlu1 %v3520_v10, %s3142_s21  ;;  %1436 = vrot.lane.b32.xlu0 %v3520_v10, %s3143_s1 }
 0xc26   :  { %1332 = vrot.lane.b32.xlu1 %v3520_v10, %s3144_s15  ;;  %1434 = vrot.lane.b32.xlu0 %v3520_v10, %s3145_s2 }
 0xc2a   :  { %1383 = vrot.lane.b32.xlu1 %v3520_v10, %s3146_s5 }
 0xc90   :  { %v1335_v11 = vpop.permute.xlu1 %1334  ;;  %v1284_v12 = vpop.permute.xlu0 %1283 }
 0xc91   :  { %v1340_v13 = vsel %vm359_vm2, %v1335_v11, 0  ;;  %v1289_v14 = vsel %vm359_vm2, %v1284_v12, 0 }
 0xc92   :  { %2554 = vmatpush3.bf16.xpose.msra.mxu0 %v1289_v14  ;;  %2560 = vmatpush3.bf16.xpose.msra.mxu1 %v1340_v13 }
 0xc93   :  { %2565 = vmatprep.subr.bf16.mxu0 %v3138_v15  ;;  %2571 = vmatprep.subr.bf16.mxu1 %v3138_v15 }
 0xc94   :  { %v1386_v16 = vpop.permute.xlu1 %1385  ;;  %v1437_v17 = vpop.permute.xlu0 %1436 }
 0xc95   :  { %v1391_v18 = vsel %vm359_vm2, %v1386_v16, 0  ;;  %v1442_v19 = vsel %vm359_vm2, %v1437_v17, 0 }
 0xc98   :  { %v1333_v41 = vpop.permute.xlu1 %1332  ;;  %v1435_v20 = vpop.permute.xlu0 %1434 }
 0xc99   :  { %2556 = vmatmul.mubr.msk.bf16.vlgmr.msra.gmra.mxu0 %vm359_vm2, %v3520_v10  ;;  %2562 = vmatmul.mubr.msk.bf16.vlgmr.msra.gmra.mxu1 %vm359_vm2, %v1333_v41 }
 0xc9a   :  { %2566 = vmatpush3.bf16.xpose.msra.mxu0 %v1391_v18  ;;  %2572 = vmatpush3.bf16.xpose.msra.mxu1 %v1442_v19 }
 0xc9b   :  { %2567 = vmatprep.mubr.msk.bf16.mxu0 %vm3139_vm1, %v3138_v15  ;;  %2573 = vmatprep.mubr.msk.bf16.mxu1 %vm3139_vm1, %v3138_v15 }
 0xc9c   :  { %2577 = vmatprep.subr.bf16.mxu0 %v3138_v15  ;;  %2583 = vmatprep.subr.bf16.mxu1 %v3138_v15  ;;  %v1384_v21 = vpop.permute.xlu1 %1383 }
 0xca1   :  { %2568 = vmatmul.mubr.msk.bf16.vlgmr.msra.gmra.mxu0 %vm359_vm2, %v1384_v21  ;;  %2574 = vmatmul.mubr.msk.bf16.vlgmr.msra.gmra.mxu1 %vm359_vm2, %v1435_v20 }
 0xca2   :  { %2579 = vmatprep.mubr.msk.bf16.mxu0 %vm3139_vm1, %v3138_v15  ;;  %2585 = vmatprep.mubr.msk.bf16.mxu1 %vm3139_vm1, %v3138_v15 }
 0xd59   :  { %v1325_v22 = vpop.f32.mrf.mxu0  ;;  %v1376_v23 = vpop.f32.mrf.mxu1 }
 0xd5a   :  { %v1485_v24 = vadd.f32 %v1325_v22, %v3391_v53  ;;  %v1487_v25 = vadd.f32 %v1376_v23, %v3391_v53 }
 0xd5b   :  { %v2557_v26 = vpop.f32.mrf.mxu0  ;;  %v2563_v27 = vpop.f32.mrf.mxu1 }
 0xd5c   :  { %v1493_v28 = vsel %vm568_vm3, %v1485_v24, -inf  ;;  %v1499_v29 = vsel %vm568_vm3, %v1487_v25, -inf }
 0xd5d   :  { %1494 = vmax.xlane.f32.xlu1 %v1493_v28  ;;  %v1328_v30 = vpop.f32.mrf.mxu0  ;;  %1500 = vmax.xlane.f32.xlu0 %v1499_v29  ;;  %v1379_v33 = vpop.f32.mrf.mxu1 }
 0xd5e   :  { %v1486_v34 = vadd.f32 %v1328_v30, %v3395_v60  ;;  %v1488_v36 = vadd.f32 %v1379_v33, %v3395_v60 }
 0xd5f   :  { %v2558_v31 = vpop.f32.mrf.mxu0  ;;  %v2564_v35 = vpop.f32.mrf.mxu1 }
 0xd60   :  { %v1496_v32 = vsel %vm568_vm3, %v1486_v34, -inf  ;;  %v1502_v45 = vsel %vm568_vm3, %v1488_v36, -inf }
 0xd61   :  { %v1427_v37 = vpop.f32.mrf.mxu0  ;;  %1497 = vmax.xlane.f32.xlu0 %v1496_v32  ;;  %v1478_v38 = vpop.f32.mrf.mxu1 }
 0xd62   :  { %v1489_v39 = vadd.f32 %v1427_v37, %v3391_v53  ;;  %v1491_v43 = vadd.f32 %v1478_v38, %v3391_v53 }
 0xd63   :  { %v2569_v40 = vpop.f32.mrf.mxu0  ;;  %v2575_v42 = vpop.f32.mrf.mxu1 }
 0xd64   :  { %v1505_v44 = vsel %vm568_vm3, %v1489_v39, -inf  ;;  %v1511_v54 = vsel %vm568_vm3, %v1491_v43, -inf }
 0xd65   :  { %1506 = vmax.xlane.f32.xlu1 %v1505_v44  ;;  %v1430_v46 = vpop.f32.mrf.mxu0  ;;  %1503 = vmax.xlane.f32.xlu0 %v1502_v45  ;;  %v1481_v47 = vpop.f32.mrf.mxu1 }
 0xd66   :  { %v1490_v48 = vadd.f32 %v1430_v46, %v3395_v60  ;;  %v1492_v51 = vadd.f32 %v1481_v47, %v3395_v60 }
 0xd67   :  { %v2570_v49 = vpop.f32.mrf.mxu0  ;;  %v2576_v50 = vpop.f32.mrf.mxu1 }
 0xd68   :  { %v1508_v52 = vsel %vm568_vm3, %v1490_v48, -inf  ;;  %v1514_v53 = vsel %vm568_vm3, %v1492_v51, -inf }
 0xd69   :  { %1509 = vmax.xlane.f32.xlu0 %v1508_v52  ;;  %1512 = vmax.xlane.f32.xlu1 %v1511_v54 }
 0xd6d   :  { %1515 = vmax.xlane.f32.xlu0 %v1514_v53 }
 0xd7a   :  { %1585 = vrot.lane.b32.xlu1 %v3520_v10, %s3147_s7 }
 0xde6   :  { %v1495_v55 = vpop.xlane.xlu1 %1494  ;;  %v1501_v56 = vpop.xlane.xlu0 %1500 }
 0xde7   :  { %v1517_v57 = vsub.f32 %v1485_v24, %v1495_v55  ;;  %v1519_v58 = vsub.f32 %v1487_v25, %v1501_v56 }
 0xde9   :  { %v1525_v59 = vmul.f32 1.442695, %v1517_v57  ;;  %v1529_v61 = vmul.f32 1.442695, %v1519_v58 }
 0xdea   :  { %v1498_v62 = vpop.xlane.xlu0 %1497 }
 0xdeb   :  { %2779 = vpow2.f32 %v1525_v59  ;;  %v1518_v60 = vsub.f32 %v1486_v34, %v1498_v62 }
 0xdec   :  { %2781 = vpow2.f32 %v1529_v61 }
 0xded   :  { %v1527_v63 = vmul.f32 1.442695, %v1518_v60 }
 0xdee   :  { %v1507_v2 = vpop.xlane.xlu1 %1506  ;;  %v1504_v3 = vpop.xlane.xlu0 %1503 }
 0xdef   :  { %2783 = vpow2.f32 %v1527_v63  ;;  %v1521_v4 = vsub.f32 %v1489_v39, %v1507_v2  ;;  %v1520_v5 = vsub.f32 %v1488_v36, %v1504_v3 }
 0xdf1   :  { %v1533_v6 = vmul.f32 1.442695, %v1521_v4  ;;  %v1531_v7 = vmul.f32 1.442695, %v1520_v5 }
 0xdf2   :  { %v1510_v8 = vpop.xlane.xlu0 %1509  ;;  %v1513_v9 = vpop.xlane.xlu1 %1512 }
 0xdf3   :  { %2785 = vpow2.f32 %v1533_v6  ;;  %v1522_v11 = vsub.f32 %v1490_v48, %v1510_v8  ;;  %v1523_v12 = vsub.f32 %v1491_v43, %v1513_v9  ;;  %v2719_v6 = vld [vmem:[%s3693_s6 + $0x18] sm:$0xff]  }
 0xdf4   :  { %2787 = vpow2.f32 %v1531_v7 }
 0xdf5   :  { %v1535_v13 = vmul.f32 1.442695, %v1522_v11  ;;  %v1537_v14 = vmul.f32 1.442695, %v1523_v12  ;;  %v2720_v12 = vld [vmem:[%s3693_s6 + $0x10] sm:$0xff]  }
 0xdf6   :  { %v1586_v16 = vpop.permute.xlu1 %1585  ;;  %v1516_v17 = vpop.xlane.xlu0 %1515 }
 0xdf7   :  { %2789 = vpow2.f32 %v1535_v13  ;;  %v1524_v41 = vsub.f32 %v1492_v51, %v1516_v17  ;;  %2578 = vmatpush3.bf16.msra.mxu0 %v1586_v16 }
 0xdf8   :  { %v2780_v18 = vpop.eup %2779  ;;  %2791 = vpow2.f32 %v1537_v14  ;;  %2589 = vmatprep.subr.bf16.mxu0 %v3138_v15 }
 0xdf9   :  { %v1539_v19 = vmul.f32 1.442695, %v1524_v41  ;;  %v1541_v20 = vsel %vm568_vm3, %v2780_v18, 0.0  ;;  %v2782_v21 = vpop.eup %2781 }
 0xdfa   :  { %1542 = vadd.xlane.f32.xlu1 %v1541_v20  ;;  %v1547_v23 = vsel %vm568_vm3, %v2782_v21, 0.0 }
 0xdfb   :  { %2793 = vpow2.f32 %v1539_v19 }
 0xdfc   :  { %v2784_v22 = vpop.eup %2783 }
 0xdfd   :  { %v1544_v24 = vsel %vm568_vm3, %v2784_v22, 0.0 }
 0xdfe   :  { %1548 = vadd.xlane.f32.xlu1 %v1547_v23  ;;  %1545 = vadd.xlane.f32.xlu0 %v1544_v24 }
 0xe00   :  { %v2786_v25 = vpop.eup %2785 }
 0xe01   :  { %v2788_v26 = vpop.eup %2787  ;;  %v1553_v27 = vsel %vm568_vm3, %v2786_v25, 0.0 }
 0xe02   :  { %1554 = vadd.xlane.f32.xlu1 %v1553_v27  ;;  %v1550_v28 = vsel %vm568_vm3, %v2788_v26, 0.0 }
 0xe03   :  { %1551 = vadd.xlane.f32.xlu0 %v1550_v28 }
 0xe04   :  { %v2790_v29 = vpop.eup %2789 }
 0xe05   :  { %v2792_v30 = vpop.eup %2791  ;;  %v1556_v33 = vsel %vm568_vm3, %v2790_v29, 0.0 }
 0xe06   :  { %v1559_v34 = vsel %vm568_vm3, %v2792_v30, 0.0 }
 0xe07   :  { %1560 = vadd.xlane.f32.xlu1 %v1559_v34  ;;  %1557 = vadd.xlane.f32.xlu0 %v1556_v33 }
 0xe08   :  { %v2794_v31 = vpop.eup %2793 }
 0xe09   :  { %v1562_v35 = vsel %vm568_vm3, %v2794_v31, 0.0 }
 0xe0b   :  { %1563 = vadd.xlane.f32.xlu0 %v1562_v35 }
 0xe18   :  { %1679 = vrot.lane.b32.xlu1 %v3520_v10, %s3148_s23 }
 0xe1c   :  { %1726 = vrot.lane.b32.xlu1 %v3520_v10, %s3149_s8 }
 0xe21   :  { %1632 = vrot.lane.b32.xlu0 %v3520_v10, %s3150_s26 }
 0xe83   :  { %v1543_v36 = vpop.xlane.xlu1 %1542 }
 0xe84   :  { %2795 = vrcp.f32 %v1543_v36 }
 0xe87   :  { %v1549_v32 = vpop.xlane.xlu1 %1548  ;;  %v1546_v37 = vpop.xlane.xlu0 %1545 }
 0xe88   :  { %2797 = vrcp.f32 %v1546_v37 }
 0xe89   :  { %2799 = vrcp.f32 %v1549_v32 }
 0xe8b   :  { %v1555_v38 = vpop.xlane.xlu1 %1554 }
 0xe8c   :  { %v1552_v39 = vpop.xlane.xlu0 %1551 }
 0xe8d   :  { %2801 = vrcp.f32 %v1552_v39 }
 0xe8e   :  { %2803 = vrcp.f32 %v1555_v38 }
 0xe90   :  { %v1561_v40 = vpop.xlane.xlu1 %1560  ;;  %v1558_v42 = vpop.xlane.xlu0 %1557 }
 0xe91   :  { %2805 = vrcp.f32 %v1558_v42  ;;  %v2796_v43 = vpop.eup %2795 }
 0xe92   :  { %2807 = vrcp.f32 %v1561_v40  ;;  %v1573_v46 = vmul.f32 %v2796_v43, %v2780_v18  ;;  %v2357_v43 = vld [vmem:[#allocation11 + $0x1] ss:$0 sm:$0xff] }
 0xe94   :  { %v1564_v44 = vpop.xlane.xlu0 %1563  ;;  %v1680_v49 = vpop.permute.xlu1 %1679 }
 0xe95   :  { %2809 = vrcp.f32 %v1564_v44  ;;  %v2798_v45 = vpop.eup %2797 }
 0xe96   :  { %v1574_v10 = vmul.f32 %v2798_v45, %v2784_v22  ;;  %v2800_v47 = vpop.eup %2799 }
 0xe97   :  { %v1575_v52 = vmul.f32 %v2800_v47, %v2782_v21 }
 0xe98   :  { %v1633_v48 = vpop.permute.xlu0 %1632  ;;  %v1581_v50 = vpack.c.bf16 %v1574_v10, %v1573_v46  ;;  %v1727_v57 = vpop.permute.xlu1 %1726 }
 0xe99   :  { %2584 = vmatpush3.bf16.msra.mxu1 %v1633_v48 }
 0xe9a   :  { %v2802_v51 = vpop.eup %2801  ;;  %2595 = vmatprep.subr.bf16.mxu1 %v3138_v15  ;;  %2580 = vmatmul.mubr.msk.bf16.vlgmr.msra.gmra.mxu0 %vm568_vm3, %v1581_v50 }
 0xe9b   :  { %v1576_v54 = vmul.f32 %v2802_v51, %v2788_v26  ;;  %2590 = vmatpush3.bf16.msra.mxu0 %v1680_v49  ;;  %2591 = vmatprep.mubr.msk.bf16.mxu0 %vm3139_vm1, %v3138_v15  ;;  %v2804_v53 = vpop.eup %2803 }
 0xe9c   :  { %2601 = vmatprep.subr.bf16.mxu0 %v3138_v15  ;;  %v1577_v59 = vmul.f32 %v2804_v53, %v2786_v25 }
 0xe9d   :  { %v1582_v55 = vpack.c.bf16 %v1576_v54, %v1575_v52 }
 0xe9e   :  { %v2806_v56 = vpop.eup %2805 }
 0xe9f   :  { %2586 = vmatmul.mubr.msk.bf16.vlgmr.msra.gmra.mxu1 %vm568_vm3, %v1582_v55  ;;  %v2808_v58 = vpop.eup %2807  ;;  %v1578_v61 = vmul.f32 %v2806_v56, %v2790_v29 }
 0xea0   :  { %2596 = vmatpush3.bf16.msra.mxu1 %v1727_v57  ;;  %2597 = vmatprep.mubr.msk.bf16.mxu1 %vm3139_vm1, %v3138_v15  ;;  %v1579_v63 = vmul.f32 %v2808_v58, %v2792_v30 }
 0xea1   :  { %2609 = vmatprep.subr.bf16.mxu1 %v3138_v15  ;;  %v1583_v60 = vpack.c.bf16 %v1578_v61, %v1577_v59 }
 0xea2   :  { %v2810_v62 = vpop.eup %2809 }
 0xea3   :  { %v1580_v2 = vmul.f32 %v2810_v62, %v2794_v31  ;;  %2592 = vmatmul.mubr.msk.bf16.vlgmr.msra.gmra.mxu0 %vm568_vm3, %v1583_v60  ;;  %v2722_v60 = vld [vmem:[%s3697_s10 + $0x10] sm:$0xff]  }
 0xea4   :  { %2605 = vmatprep.mubr.msk.bf16.mxu0 %vm3139_vm1, %v3138_v15  ;;  %2602 = vmatpush3.bf16.msra.mxu0 %v2719_v6 }
 0xea5   :  { %v1584_v3 = vpack.c.bf16 %v1580_v2, %v1579_v63  ;;  %2603 = vmatprep.subr.bf16.mxu0 %v3138_v15 }
 0xea7   :  { %2598 = vmatmul.mubr.msk.bf16.vlgmr.msra.gmra.mxu1 %vm568_vm3, %v1584_v3 }
 0xea8   :  { %2613 = vmatprep.mubr.msk.bf16.mxu1 %vm3139_vm1, %v3138_v15  ;;  %2604 = vmatpush3.bf16.msra.mxu0 %v2720_v12 }
 0xea9   :  { %2617 = vmatprep.subr.bf16.mxu0 %v3138_v15 }
 0xf5a   :  { %v1625_v4 = vpop.f32.mrf.mxu0 }
 0xf5c   :  { %v2581_v5 = vpop.f32.mrf.mxu0 }
 0xf5e   :  { %v1628_v7 = vpop.f32.mrf.mxu0 }
 0xf5f   :  { %v1672_v8 = vpop.f32.mrf.mxu1 }
 0xf60   :  { %v2582_v9 = vpop.f32.mrf.mxu0 }
 0xf61   :  { %v2587_v11 = vpop.f32.mrf.mxu1  ;;  %v2361_v9 = vld [vmem:[#allocation13 + $0x1] ss:$0 sm:$0xff] }
 0xf63   :  { %v1675_v13 = vpop.f32.mrf.mxu1  ;;  %v1719_v16 = vpop.f32.mrf.mxu0 }
 0xf64   :  { %v2692_v14 = vpack.i.bf16 %v1675_v13, %v1672_v8 }
 0xf65   :  { %v2588_v17 = vpop.f32.mrf.mxu1  ;;  %v2593_v41 = vpop.f32.mrf.mxu0 }
 0xf66   :  { %2693 = vrot.lane.b32.xlu1 %v2692_v14, %s3124_s3  ;;  %v2362_v14 = vld [vmem:[#allocation14 + $0x1] ss:$0 sm:$0xff] }
 0xf67   :  { %v1766_v18 = vpop.f32.mrf.mxu1  ;;  %v1722_v19 = vpop.f32.mrf.mxu0 }
 0xf68   :  { %v2697_v20 = vpack.i.bf16 %v1722_v19, %v1719_v16  ;;  %v2723_v19 = vld [vmem:[%s3699_s12 + $0x38] sm:$0xff]  }
 0xf69   :  { %v2599_v21 = vpop.f32.mrf.mxu1  ;;  %v2594_v22 = vpop.f32.mrf.mxu0 }
 0xf6a   :  { %2698 = vrot.lane.b32.xlu0 %v2697_v20, %s3127_s22  ;;  %v2724_v20 = vld [vmem:[%s3699_s12 + $0x30] sm:$0xff]   ;;  %v2725_v21 = vld [vmem:[%s3699_s12 + $0x28] sm:$0xff]   ;;  %v2726_v22 = vld [vmem:[%s3699_s12 + $0x20] sm:$0xff]  }
 0xf6b   :  { %v1769_v23 = vpop.f32.mrf.mxu1 }
 0xf6c   :  { %v2702_v24 = vpack.i.bf16 %v1769_v23, %v1766_v18  ;;  %v2367_v23 = vld [vmem:[#allocation16 + $0x1] ss:$0 sm:$0xff] }
 0xf6d   :  { %v2600_v25 = vpop.f32.mrf.mxu1 }
 0xf6e   :  { %2703 = vrot.lane.b32.xlu1 %v2702_v24, %s3151_s11 }
 0xfd8   :  { %v2694_v26 = vpop.permute.xlu1 %2693 }
 0xfd9   :  { %v2696_v27 = vunpack.i.h.bf16 %v2694_v26  ;;  %v2695_v28 = vunpack.i.l.bf16 %v2694_v26 }
 0xfdb   :  { %v1798_v31 = vsel %vm359_vm2, %v1628_v7, %v2696_v27  ;;  %v1797_v35 = vsel %vm359_vm2, %v1625_v4, %v2695_v28 }
 0xfdc   :  { %v2699_v29 = vpop.permute.xlu0 %2698 }
 0xfdd   :  { %v2701_v30 = vunpack.i.h.bf16 %v2699_v29  ;;  %v2700_v33 = vunpack.i.l.bf16 %v2699_v29 }
 0xfdf   :  { %v1799_v37 = vsel %vm568_vm3, %v1797_v35, %v2700_v33  ;;  %v1800_v38 = vsel %vm568_vm3, %v1798_v31, %v2701_v30 }
 0xfe0   :  { %v2704_v34 = vpop.permute.xlu1 %2703 }
 0xfe1   :  { %v2706_v36 = vunpack.i.h.bf16 %v2704_v34  ;;  %v2705_v32 = vunpack.i.l.bf16 %v2704_v34 }
 0xfe3   :  { %v1802_v39 = vsel %vm877_vm4, %v1800_v38, %v2706_v36  ;;  %v1801_v40 = vsel %vm877_vm4, %v1799_v37, %v2705_v32 }
 0xfe4   :  { %v1803_v42 = vpack.c.bf16 %v1802_v39, %v1801_v40 }
 0xfe6   :  { %2606 = vmatmul.mubr.msk.bf16.vlgmr.msra.gmra.mxu0 %vm243_vm0, %v1803_v42 }
 0xfe7   :  { %2625 = vmatprep.mubr.msk.bf16.mxu0 %vm3139_vm1, %v3138_v15  ;;  %2618 = vmatpush3.bf16.msra.mxu0 %v2723_v19 }
 0xfe8   :  { %2619 = vmatprep.subr.bf16.mxu0 %v3138_v15 }
 0xfeb   :  { %2620 = vmatpush3.bf16.msra.mxu0 %v2724_v20 }
 0xfec   :  { %2621 = vmatprep.subr.bf16.mxu0 %v3138_v15 }
 0xfef   :  { %2622 = vmatpush3.bf16.msra.mxu0 %v2725_v21 }
 0xff0   :  { %2623 = vmatprep.subr.bf16.mxu0 %v3138_v15 }
 0xff3   :  { %2624 = vmatpush3.bf16.msra.mxu0 %v2726_v22  ;;  %v2386_v22 = vld [vmem:[#allocation20 + $0x1] ss:$0 sm:$0xff] }
0x10a6   :  { %v1866_v44 = vpop.f32.mrf.mxu0 }
0x10a7   :  { %v1867_v45 = vadd.f32 %v2357_v43, %v1866_v44 }
0x10a8   :  { %v2607_v46 = vpop.f32.mrf.mxu0 }
0x10a9   :  { %v1873_v10 = vadd.f32 %v1867_v45, %v3511_v0 }
0x10aa   :  { %v1869_v47 = vpop.f32.mrf.mxu0 }
0x10ab   :  { %v1870_v48 = vadd.f32 %v2357_v43, %v1869_v47  ;;  %v1879_v49 = vsel %vm243_vm0, %v1873_v10, 0.0 }
0x10ac   :  { %1880 = vadd.xlane.f32.xlu0 %v1879_v49  ;;  %v2608_v50 = vpop.f32.mrf.mxu0  ;;  %v2379_v49 = vld [vmem:[#allocation17 + $0x1] ss:$0 sm:$0xff] }
0x10ad   :  { %v1874_v51 = vadd.f32 %v1870_v48, %v3513_v1  ;;  %v2721_v1 = vld [vmem:[%s3697_s10 + $0x18] sm:$0xff]  }
0x10ae   :  { %2610 = vmatpush3.bf16.msra.mxu1 %v2721_v1 }
0x10af   :  { %v1882_v52 = vsel %vm243_vm0, %v1874_v51, 0.0  ;;  %2611 = vmatprep.subr.bf16.mxu1 %v3138_v15 }
0x10b0   :  { %1883 = vadd.xlane.f32.xlu1 %v1882_v52 }
0x10b2   :  { %2612 = vmatpush3.bf16.msra.mxu1 %v2722_v60 }
0x10b3   :  { %2629 = vmatprep.subr.bf16.mxu1 %v3138_v15 }
0x1135   :  { %v1881_v54 = vpop.xlane.xlu0 %1880 }
0x1136   :  { %v1885_v53 = vmul.f32 0.03125, %v1881_v54 }
0x1138   :  { %v1887_v55 = vsub.f32 %v1873_v10, %v1885_v53 }
0x1139   :  { %v1884_v56 = vpop.xlane.xlu1 %1883 }
0x113a   :  { %v1886_v57 = vmul.f32 0.03125, %v1884_v56  ;;  %v1889_v58 = vmul.f32 %v1887_v55, %v1887_v55 }
0x113c   :  { %v1888_v59 = vsub.f32 %v1874_v51, %v1886_v57  ;;  %v1891_v0 = vsel %vm243_vm0, %v1889_v58, 0.0 }
0x113d   :  { %1892 = vadd.xlane.f32.xlu0 %v1891_v0 }
0x113e   :  { %v1890_v61 = vmul.f32 %v1888_v59, %v1888_v59 }
0x1140   :  { %v1894_v62 = vsel %vm243_vm0, %v1890_v61, 0.0 }
0x1141   :  { %1895 = vadd.xlane.f32.xlu0 %v1894_v62 }
0x11c6   :  { %v1893_v63 = vpop.xlane.xlu0 %1892 }
0x11c7   :  { %v1897_v2 = vmul.f32 0.03125, %v1893_v63 }
0x11c9   :  { %v1899_v3 = vadd.f32 1e-12, %v1897_v2 }
0x11ca   :  { %v1896_v4 = vpop.xlane.xlu0 %1895 }
0x11cb   :  { %2811 = vrsqrt.f32 %v1899_v3  ;;  %v1898_v5 = vmul.f32 0.03125, %v1896_v4 }
0x11cd   :  { %v1900_v6 = vadd.f32 1e-12, %v1898_v5 }
0x11cf   :  { %2813 = vrsqrt.f32 %v1900_v6  ;;  %v2727_v6 = vld [vmem:[%s3703_s16 + $0x8] sm:$0xff]  }
0x11d8   :  { %v2812_v7 = vpop.eup %2811 }
0x11d9   :  { %v1903_v8 = vmul.f32 %v2812_v7, %v1887_v55  ;;  %v2728_v7 = vld [vmem:[%s3703_s16] sm:$0xff]  }
0x11db   :  { %v1911_v13 = vmul.f32 %v2361_v9, %v1903_v8 }
0x11dc   :  { %v2814_v11 = vpop.eup %2813 }
0x11dd   :  { %v1904_v12 = vmul.f32 %v2814_v11, %v1888_v59  ;;  %v1919_v17 = vadd.f32 %v2362_v14, %v1911_v13 }
0x11df   :  { %v1912_v16 = vmul.f32 %v2361_v9, %v1904_v12 }
0x11e1   :  { %v1920_v41 = vadd.f32 %v2362_v14, %v1912_v16 }
0x11e3   :  { %v1921_v18 = vpack.c.bf16 %v1920_v41, %v1919_v17 }
0x11e5   :  { %2614 = vmatmul.mubr.msk.bf16.vlgmr.msra.gmra.mxu1 %vm243_vm0, %v1921_v18  ;;  %v2385_v18 = vld [vmem:[#allocation19 + $0x1] ss:$0 sm:$0xff] }
0x11e6   :  { %2633 = vmatprep.mubr.msk.bf16.mxu1 %vm3139_vm1, %v3138_v15  ;;  %2630 = vmatpush3.bf16.msra.mxu1 %v2727_v6 }
0x11e7   :  { %2631 = vmatprep.subr.bf16.mxu1 %v3138_v15 }
0x11ea   :  { %2632 = vmatpush3.bf16.msra.mxu1 %v2728_v7 }
0x11eb   :  { %2637 = vmatprep.subr.bf16.mxu1 %v3138_v15 }
0x12a5   :  { %v1984_v24 = vpop.f32.mrf.mxu1 }
0x12a6   :  { %v1985_v25 = vadd.f32 %v2367_v23, %v1984_v24 }
0x12a7   :  { %v2615_v26 = vpop.f32.mrf.mxu1 }
0x12a8   :  { %v1991_v27 = vmul.f32 %v1985_v25, %v1985_v25 }
0x12a9   :  { %v1987_v28 = vpop.f32.mrf.mxu1 }
0x12aa   :  { %v1993_v29 = vmul.f32 %v1991_v27, %v1985_v25  ;;  %v1988_v30 = vadd.f32 %v2367_v23, %v1987_v28  ;;  %v2729_v28 = vld [vmem:[%s3705_s18 + $0x8] sm:$0xff]  }
0x12ab   :  { %v2616_v33 = vpop.f32.mrf.mxu1 }
0x12ac   :  { %v1995_v34 = vmul.f32 0.044715, %v1993_v29  ;;  %v1992_v31 = vmul.f32 %v1988_v30, %v1988_v30  ;;  %v2730_v29 = vld [vmem:[%s3705_s18] sm:$0xff]   ;;  %s3085_s18 = scalar_lea.vmem %s2291_s4, 32 }
0x12ad   :  { %p3086_p9 = scmp.ne.s32.totalorder %s2291_s4, %s3085_s18  ;;  %p3091_p11 = scmp.lt.s32.totalorder %s3085_s18, %s3085_s18 }
0x12ae   :  { %v1997_v35 = vadd.f32 %v1995_v34, %v1985_v25  ;;  %v1994_v36 = vmul.f32 %v1992_v31, %v1988_v30 }
0x12af   :  { %p3092_p12 = por %p3091_p11, %p3090_p10 }
0x12b0   :  { %v1999_v32 = vmul.f32 0.7978846, %v1997_v35  ;;  %v1996_v37 = vmul.f32 0.044715, %v1994_v36 }
0x12b1   :  { %p3093_p13 = pnand %p3092_p12, %p3086_p9 }
0x12b2   :  { %2815 = vtanh.f32 %v1999_v32  ;;  %v1998_v38 = vadd.f32 %v1996_v37, %v1988_v30 }
0x12b4   :  { %v2000_v39 = vmul.f32 0.7978846, %v1998_v38 }
0x12b6   :  { %2817 = vtanh.f32 %v2000_v39 }
0x12bf   :  { %v2816_v40 = vpop.eup %2815 }
0x12c0   :  { %v2003_v42 = vadd.f32 1.0, %v2816_v40 }
0x12c2   :  { %v2005_v44 = vmul.f32 0.5, %v2003_v42 }
0x12c3   :  { %v2818_v43 = vpop.eup %2817 }
0x12c4   :  { %v2004_v45 = vadd.f32 1.0, %v2818_v43  ;;  %v2007_v10 = vmul.f32 %v2005_v44, %v1985_v25 }
0x12c6   :  { %v2006_v46 = vmul.f32 0.5, %v2004_v45 }
0x12c8   :  { %v2008_v47 = vmul.f32 %v2006_v46, %v1988_v30  ;;  %v2387_v30 = vld [vmem:[#allocation22] ss:$0 sm:$0xff] }
0x12ca   :  { %v2009_v48 = vpack.c.bf16 %v2008_v47, %v2007_v10 }
0x12cc   :  { %2626 = vmatmul.mubr.msk.bf16.vlgmr.msra.gmra.mxu0 %vm1120_vm5, %v2009_v48 }
0x138c   :  { %v2088_v50 = vpop.f32.mrf.mxu0 }
0x138d   :  { %v2089_v51 = vadd.f32 %v2379_v49, %v2088_v50 }
0x138e   :  { %v2627_v52 = vpop.f32.mrf.mxu0 }
0x138f   :  { %v2095_v54 = vadd.f32 %v2089_v51, %v1919_v17 }
0x1390   :  { %v2091_v53 = vpop.f32.mrf.mxu0 }
0x1391   :  { %v2092_v55 = vadd.f32 %v2379_v49, %v2091_v53  ;;  %v2101_v56 = vsel %vm243_vm0, %v2095_v54, 0.0 }
0x1392   :  { %2102 = vadd.xlane.f32.xlu1 %v2101_v56  ;;  %v2628_v57 = vpop.f32.mrf.mxu0 }
0x1393   :  { %v2096_v58 = vadd.f32 %v2092_v55, %v1920_v41 }
0x1395   :  { %v2104_v59 = vsel %vm243_vm0, %v2096_v58, 0.0 }
0x1396   :  { %2105 = vadd.xlane.f32.xlu0 %v2104_v59 }
0x141b   :  { %v2103_v0 = vpop.xlane.xlu1 %2102 }
0x141c   :  { %v2107_v61 = vmul.f32 0.03125, %v2103_v0 }
0x141e   :  { %v2109_v62 = vsub.f32 %v2095_v54, %v2107_v61 }
0x141f   :  { %v2106_v1 = vpop.xlane.xlu0 %2105 }
0x1420   :  { %v2108_v60 = vmul.f32 0.03125, %v2106_v1  ;;  %v2111_v63 = vmul.f32 %v2109_v62, %v2109_v62 }
0x1422   :  { %v2110_v2 = vsub.f32 %v2096_v58, %v2108_v60  ;;  %v2113_v3 = vsel %vm243_vm0, %v2111_v63, 0.0 }
0x1423   :  { %2114 = vadd.xlane.f32.xlu1 %v2113_v3 }
0x1424   :  { %v2112_v4 = vmul.f32 %v2110_v2, %v2110_v2 }
0x1426   :  { %v2116_v5 = vsel %vm243_vm0, %v2112_v4, 0.0 }
0x1427   :  { %2117 = vadd.xlane.f32.xlu0 %v2116_v5 }
0x14ac   :  { %v2115_v8 = vpop.xlane.xlu1 %2114 }
0x14ad   :  { %v2119_v9 = vmul.f32 0.03125, %v2115_v8 }
0x14af   :  { %v2121_v11 = vadd.f32 1e-12, %v2119_v9 }
0x14b0   :  { %v2118_v12 = vpop.xlane.xlu0 %2117 }
0x14b1   :  { %2819 = vrsqrt.f32 %v2121_v11  ;;  %v2120_v13 = vmul.f32 0.03125, %v2118_v12 }
0x14b3   :  { %v2122_v14 = vadd.f32 1e-12, %v2120_v13 }
0x14b5   :  { %2821 = vrsqrt.f32 %v2122_v14 }
0x14be   :  { %v2820_v16 = vpop.eup %2819 }
0x14bf   :  { %v2125_v17 = vmul.f32 %v2820_v16, %v2109_v62 }
0x14c1   :  { %v2133_v20 = vmul.f32 %v2385_v18, %v2125_v17 }
0x14c2   :  { %v2822_v41 = vpop.eup %2821 }
0x14c3   :  { %v2126_v19 = vmul.f32 %v2822_v41, %v2110_v2  ;;  %v2141_v24 = vadd.f32 %v2386_v22, %v2133_v20 }
0x14c5   :  { %v2134_v21 = vmul.f32 %v2385_v18, %v2126_v19 }
0x14c7   :  { %v2142_v23 = vadd.f32 %v2386_v22, %v2134_v21 }
0x14c9   :  { %v2144_v25 = vrot.slane %v2142_v23, 7 }
0x14cb   :  { %v2147_v26 = vsel %vm2146_vm6, %v2141_v24, %v2144_v25 }
0x14cc   :  { %v2148_v27 = vpack.c.bf16 %v2147_v26, %v2147_v26 }
0x14ce   :  { %2634 = vmatmul.mubr.msk.bf16.vlgmr.msra.gmra.mxu1 %vm243_vm0, %v2148_v27 }
0x14cf   :  { %2641 = vmatprep.mubr.msk.bf16.mxu1 %vm3139_vm1, %v3138_v15  ;;  %2638 = vmatpush3.bf16.msra.mxu1 %v2729_v28 }
0x14d0   :  { %2639 = vmatprep.subr.bf16.mxu1 %v3138_v15  ;;  %v2391_v15 = vld [vmem:[%s3706_s19] ss:$0 sm:$0xff] }
0x14d3   :  { %2640 = vmatpush3.bf16.msra.mxu1 %v2730_v29 }
0x158e   :  { %v2209_v33 = vpop.f32.mrf.mxu1 }
0x158f   :  { %v2210_v34 = vadd.f32 %v2387_v30, %v2209_v33 }
0x1590   :  { %v2635_v31 = vpop.f32.mrf.mxu1 }
0x1591   :  { %2823 = vtanh.f32 %v2210_v34 }
0x1592   :  { %v2212_v35 = vpop.f32.mrf.mxu1 }
0x1594   :  { %v2636_v36 = vpop.f32.mrf.mxu1 }
0x159e   :  { %v2824_v32 = vpop.eup %2823 }
0x159f   :  { %v2216_v37 = vpack.c.bf16 %v2824_v32, %v2824_v32 }
0x15a1   :  { %2642 = vmatmul.mubr.msk.bf16.vlgmr.msra.gmra.mxu1 %vm243_vm0, %v2216_v37 }
0x1661   :  { %v2277_v38 = vpop.f32.mrf.mxu1 }
0x1662   :  { %v2278_v39 = vadd.f32 %v2391_v15, %v2277_v38 }
0x1663   :  { %v2643_v40 = vpop.f32.mrf.mxu1 }
0x1664   :  { %2283 = vst [vmem:[#allocation23] sm:$0x3] %v2278_v39 }
0x1665   :  { %v2280_v42 = vpop.f32.mrf.mxu1 }
0x1666   :  { %3096 = shalt.err (!%p3093_p13)
}
0x1667   :  { %s3720_s13 = sld [smem:[#allocation37_spill]]  ;;  %v2644_v43 = vpop.f32.mrf.mxu1 }
0x166d   :  { %2293 = dma.vmem_to_hbm [thread:$0]  %s2291_s4, 32, %s3720_s13, [#allocation4]  }
0x166e   :  { %3119 = dma.done.wait [#allocation4], 32  }
0x166f   :  { %3120 = vsyncadd [#allocation4], 4294967264 }
0x1670   :  { %2297 = vsyncpa [#allocation3], 1 }
0x1671   :  { %2298 = vsyncpa [#allocation6], 1 }
0x1672   :  { %2299 = vsyncpa [#allocation9], 1 }
0x1673   :  { %2300 = vsyncpa [#allocation12], 1 }
0x1674   :  { %2301 = vsyncpa [#allocation15], 1 }
0x1675   :  { %2302 = vsyncpa [#allocation18], 1 }
0x1676   :  { %2303 = vsyncpa [#allocation21], 1 }
0x1677   :  { %2304 = vsyncpa [#allocation4], 1 }

</bundles_post_ra>
